<compile_context>
chip_gen: v6e
topology: v6e:2x2x1
jax: 0.10.0
libtpu: 0.0.40
codegen_flags: <defaults>
</compile_context>

<pallas_src>
import math
from functools import partial

import jax
import jax.numpy as jnp
from jax import lax
from jax.experimental import pallas as pl
from jax.experimental.pallas import tpu as pltpu


# ----------------------------- tiling / budgets -----------------------------

_VMEM_LIMIT = 48 * 1024 * 1024    # explicit scoped-VMEM cap (safe on v5e/v6e/v7x)
_VMEM_BUDGET = 24 * 1024 * 1024   # target working set when sizing row tiles
_TINY_BYTES = 2 * 1024 * 1024     # below this, a single grid point is strictly better

_ROW_TILES = (1024, 512, 256, 128, 64, 32, 16, 8)
_COL_TILES = (2048, 1024, 512, 256, 128)


def _pick_row_tile(m, per_row_bytes, fixed_bytes):
    """Largest row tile that divides m, leaves >=2 tiles, and fits the budget."""
    if fixed_bytes + m * per_row_bytes <= _TINY_BYTES:
        return m                                   # tiny problem: one grid point
    for tm in _ROW_TILES:
        if m % tm == 0 and m // tm >= 2 and \
                fixed_bytes + tm * per_row_bytes <= _VMEM_BUDGET:
            return tm
    return m


def _pick_col_tile(f, d):
    """Reduction tile over the FFN hidden dim (weight blocks double-buffered)."""
    if 2 * d * f * 2 * 2 <= 8 * 1024 * 1024:
        return f
    for tf in _COL_TILES:
        if f % tf == 0 and 2 * d * tf * 2 * 2 <= 8 * 1024 * 1024:
            return tf
    return f


def _mosaic(sem):
    return pltpu.CompilerParams(dimension_semantics=sem,
                                vmem_limit_bytes=_VMEM_LIMIT)


# ----------------------------- Pallas kernels -----------------------------

def _layernorm(h, g, be, eps=1e-5):
    mean = jnp.mean(h, axis=-1, keepdims=True)
    var = jnp.mean(jnp.square(h - mean), axis=-1, keepdims=True)
    return (h - mean) * lax.rsqrt(var + eps) * g + be


def _split_proj_kernel(x_ref, w_ref, b_ref, *o_refs):
    # x: [tm, K] bf16, w: [K, N] bf16, b: [1, N] f32.
    # Emits N split into len(o_refs) lane-dense bf16 outputs (Q/K/V or K/V).
    h = jnp.dot(x_ref[...], w_ref[...], preferred_element_type=jnp.float32) + b_ref[...]
    n = h.shape[-1] // len(o_refs)
    for idx, o_ref in enumerate(o_refs):
        o_ref[...] = h[:, idx * n:(idx + 1) * n].astype(o_ref.dtype)


def _proj_res_ln_kernel(x_ref, w_ref, b_ref, res_ref, g_ref, be_ref, o_ref):
    # out-projection + residual add + LayerNorm, fused; f32 internally.
    h = (jnp.dot(x_ref[...], w_ref[...], preferred_element_type=jnp.float32)
         + b_ref[...] + res_ref[...].astype(jnp.float32))
    o_ref[...] = _layernorm(h, g_ref[...], be_ref[...]).astype(o_ref.dtype)


def _ffn_res_ln_kernel(x_ref, w1_ref, b1_ref, w2_ref, b2_ref, g_ref, be_ref,
                       o_ref, acc_ref):
    # FFN (linear -> ReLU -> linear) + residual + LayerNorm with a reduction
    # grid axis over d_ff: only [D, tf] / [tf, D] weight blocks and a [tm, tf]
    # intermediate are resident per step; accumulation lives in VMEM scratch.
    f = pl.program_id(1)

    @pl.when(f == 0)
    def _():
        acc_ref[...] = jnp.zeros_like(acc_ref)

    x = x_ref[...]                                           # bf16 [tm, D]
    h = jnp.dot(x, w1_ref[...], preferred_element_type=jnp.float32) + b1_ref[...]
    h = jnp.maximum(h, 0.0)
    acc_ref[...] += jnp.dot(h.astype(jnp.bfloat16), w2_ref[...],
                            preferred_element_type=jnp.float32)

    @pl.when(f == pl.num_programs(1) - 1)
    def _():
        y = acc_ref[...] + b2_ref[...] + x.astype(jnp.float32)
        o_ref[...] = _layernorm(y, g_ref[...], be_ref[...]).astype(o_ref.dtype)


def _attn_kernel(mask_ref, q_ref, k_ref, v_ref, o_ref, *w_refs, scale, causal):
    # One (batch, head) grid point.  q: [1,1,Sq,Dh], k/v: [1,1,Sk,Dh] (bf16).
    # Padding / causal bias is generated on the VPU from a compact [B, Sk]
    # validity vector; no bias array is read from HBM.
    b = pl.program_id(0)
    sq, dh = q_ref.shape[2], q_ref.shape[3]
    sk = k_ref.shape[2]
    q = q_ref[...].reshape(sq, dh)
    k = k_ref[...].reshape(sk, dh)
    v = v_ref[...].reshape(sk, dh)

    s = lax.dot_general(q, k, (((1,), (1,)), ((), ())),
                        preferred_element_type=jnp.float32) * scale      # [sq, sk]

    valid = mask_ref[pl.ds(b, 1), :] > 0.5                               # [1, sk]
    if causal:
        qi = lax.broadcasted_iota(jnp.int32, (sq, sk), 0)
        ki = lax.broadcasted_iota(jnp.int32, (sq, sk), 1)
        valid = jnp.logical_and(valid, qi >= ki)
    s = jnp.where(valid, s, -1e9)

    m = jnp.max(s, axis=-1, keepdims=True)
    e = jnp.exp(s - m)
    p = e / jnp.sum(e, axis=-1, keepdims=True)        # exact softmax (weights returned)
    out = jnp.dot(p.astype(jnp.bfloat16), v, preferred_element_type=jnp.float32)
    o_ref[...] = out.reshape(1, 1, sq, dh).astype(o_ref.dtype)
    if w_refs:
        w_refs[0][...] = p.reshape(1, 1, sq, sk)


# ----------------------------- kernel wrappers -----------------------------

def split_proj(x2d, w, b, n_out):
    """Fused [M,K]x[K,n_out*N] matmul + bias, split into n_out bf16 outputs."""
    m, k = x2d.shape
    n_total = w.shape[1]
    n_each = n_total // n_out
    per_row = k * 2 * 2 + n_total * 4 + n_total * 2 * 2
    fixed = k * n_total * 2 * 2 + n_total * 4 * 2
    tm = _pick_row_tile(m, per_row, fixed)
    out_shape = tuple(jax.ShapeDtypeStruct((m, n_each), jnp.bfloat16)
                      for _ in range(n_out))
    out_specs = tuple(pl.BlockSpec((tm, n_each), lambda i: (i, 0))
                      for _ in range(n_out))
    return pl.pallas_call(
        _split_proj_kernel,
        grid=(m // tm,),
        in_specs=[pl.BlockSpec((tm, k), lambda i: (i, 0)),
                  pl.BlockSpec((k, n_total), lambda i: (0, 0)),
                  pl.BlockSpec((1, n_total), lambda i: (0, 0))],
        out_specs=out_specs,
        out_shape=out_shape,
        compiler_params=_mosaic(("parallel",)),
    )(x2d, w, b.reshape(1, -1))


def linear(x2d, w, b):
    return split_proj(x2d, w, b, 1)[0]


def proj_res_ln(x2d, w, b, res2d, g, be):
    m, k = x2d.shape
    d_out = w.shape[1]
    per_row = k * 2 * 2 + d_out * 2 * 2 * 2 + d_out * 4
    fixed = k * d_out * 2 * 2 + 3 * d_out * 4 * 2
    tm = _pick_row_tile(m, per_row, fixed)
    return pl.pallas_call(
        _proj_res_ln_kernel,
        grid=(m // tm,),
        in_specs=[pl.BlockSpec((tm, k), lambda i: (i, 0)),
                  pl.BlockSpec((k, d_out), lambda i: (0, 0)),
                  pl.BlockSpec((1, d_out), lambda i: (0, 0)),
                  pl.BlockSpec((tm, d_out), lambda i: (i, 0)),
                  pl.BlockSpec((1, d_out), lambda i: (0, 0)),
                  pl.BlockSpec((1, d_out), lambda i: (0, 0))],
        out_specs=pl.BlockSpec((tm, d_out), lambda i: (i, 0)),
        out_shape=jax.ShapeDtypeStruct((m, d_out), jnp.bfloat16),
        compiler_params=_mosaic(("parallel",)),
    )(x2d, w, b.reshape(1, -1), res2d, g.reshape(1, -1), be.reshape(1, -1))


def ffn_res_ln(x2d, w1, b1, w2, b2, g, be):
    m, d = x2d.shape
    f = w1.shape[1]
    tf = _pick_col_tile(f, d)
    per_row = d * 2 * 2 * 2 + d * 4 + tf * 4
    fixed = 2 * d * tf * 2 * 2 + (tf + 3 * d) * 4 * 2
    tm = _pick_row_tile(m, per_row, fixed)
    return pl.pallas_call(
        _ffn_res_ln_kernel,
        grid=(m // tm, f // tf),
        in_specs=[pl.BlockSpec((tm, d), lambda i, j: (i, 0)),
                  pl.BlockSpec((d, tf), lambda i, j: (0, j)),
                  pl.BlockSpec((1, tf), lambda i, j: (0, j)),
                  pl.BlockSpec((tf, d), lambda i, j: (j, 0)),
                  pl.BlockSpec((1, d), lambda i, j: (0, 0)),
                  pl.BlockSpec((1, d), lambda i, j: (0, 0)),
                  pl.BlockSpec((1, d), lambda i, j: (0, 0))],
        out_specs=pl.BlockSpec((tm, d), lambda i, j: (i, 0)),
        out_shape=jax.ShapeDtypeStruct((m, d), jnp.bfloat16),
        scratch_shapes=[pltpu.VMEM((tm, d), jnp.float32)],
        compiler_params=_mosaic(("parallel", "arbitrary")),
    )(x2d, w1, b1.reshape(1, -1), w2, b2.reshape(1, -1),
      g.reshape(1, -1), be.reshape(1, -1))


def attention(q, k, v, kv_valid, n_heads, causal, need_weights):
    """q: [B,Sq,D], k/v: [B,Sk,D] bf16; kv_valid: [B,Sk] f32 (1=valid, 0=pad)."""
    B, Sq, D = q.shape
    Sk = k.shape[1]
    Dh = D // n_heads
    # Head-major layout so each (b, h) grid point gets a full-extent 2-D tile.
    qh = q.reshape(B, Sq, n_heads, Dh).transpose(0, 2, 1, 3)
    kh = k.reshape(B, Sk, n_heads, Dh).transpose(0, 2, 1, 3)
    vh = v.reshape(B, Sk, n_heads, Dh).transpose(0, 2, 1, 3)
    kern = partial(_attn_kernel, scale=1.0 / math.sqrt(Dh), causal=causal)

    out_shape = [jax.ShapeDtypeStruct((B, n_heads, Sq, Dh), jnp.bfloat16)]
    out_specs = [pl.BlockSpec((1, 1, Sq, Dh), lambda b, h: (b, h, 0, 0))]
    if need_weights:
        out_shape.append(jax.ShapeDtypeStruct((B, n_heads, Sq, Sk), jnp.float32))
        out_specs.append(pl.BlockSpec((1, 1, Sq, Sk), lambda b, h: (b, h, 0, 0)))

    # TODO(synk): for long sequences add flash-style (q-tile, kv-tile) grid axes
    # with online softmax; the (B, H) grid already bounds VMEM per step here.
    res = pl.pallas_call(
        kern,
        grid=(B, n_heads),
        in_specs=[pl.BlockSpec((B, Sk), lambda b, h: (0, 0)),
                  pl.BlockSpec((1, 1, Sq, Dh), lambda b, h: (b, h, 0, 0)),
                  pl.BlockSpec((1, 1, Sk, Dh), lambda b, h: (b, h, 0, 0)),
                  pl.BlockSpec((1, 1, Sk, Dh), lambda b, h: (b, h, 0, 0))],
        out_specs=tuple(out_specs),
        out_shape=tuple(out_shape),
        compiler_params=_mosaic(("parallel", "parallel")),
    )(kv_valid, qh, kh, vh)

    o = res[0].transpose(0, 2, 1, 3).reshape(B, Sq, D)
    w = res[1] if need_weights else None
    return o, w


# ----------------------------- Model glue -----------------------------

def encoder_layer(p, x2d, B, S, src_valid, n_heads):
    D = x2d.shape[-1]
    q2, k2, v2 = split_proj(x2d, p["sa_w_qkv"], p["sa_b_qkv"], 3)
    attn_out, _ = attention(q2.reshape(B, S, D), k2.reshape(B, S, D),
                            v2.reshape(B, S, D), src_valid, n_heads,
                            causal=False, need_weights=False)
    h2 = proj_res_ln(attn_out.reshape(B * S, D), p["sa_wo"], p["sa_bo"], x2d,
                     p["ln1_g"], p["ln1_b"])
    h2 = ffn_res_ln(h2, p["ffn_w1"], p["ffn_b1"], p["ffn_w2"], p["ffn_b2"],
                    p["ln2_g"], p["ln2_b"])
    return h2


def decoder_layer(p, y2d, mem2d, B, St, Ss, tgt_valid, src_valid, n_heads, causal):
    D = y2d.shape[-1]

    # masked self-attention
    q2, k2, v2 = split_proj(y2d, p["sa_w_qkv"], p["sa_b_qkv"], 3)
    sa_out, sa_w = attention(q2.reshape(B, St, D), k2.reshape(B, St, D),
                             v2.reshape(B, St, D), tgt_valid, n_heads,
                             causal=causal, need_weights=True)
    h2 = proj_res_ln(sa_out.reshape(B * St, D), p["sa_wo"], p["sa_bo"], y2d,
                     p["ln1_g"], p["ln1_b"])

    # cross attention (query from decoder, fused K|V from memory)
    cq = linear(h2, p["ca_wq"], p["ca_bq"])
    ck, cv = split_proj(mem2d, p["ca_w_kv"], p["ca_b_kv"], 2)
    ca_out, ca_w = attention(cq.reshape(B, St, D), ck.reshape(B, Ss, D),
                             cv.reshape(B, Ss, D), src_valid, n_heads,
                             causal=False, need_weights=True)
    h2 = proj_res_ln(ca_out.reshape(B * St, D), p["ca_wo"], p["ca_bo"], h2,
                     p["ln2_g"], p["ln2_b"])

    # feed-forward
    h2 = ffn_res_ln(h2, p["ffn_w1"], p["ffn_b1"], p["ffn_w2"], p["ffn_b2"],
                    p["ln3_g"], p["ln3_b"])
    return h2, sa_w, ca_w


def sinusoidal_pe(max_len, d_model):
    pos = jnp.arange(max_len, dtype=jnp.float32)[:, None]
    div = jnp.exp(jnp.arange(0, d_model, 2, dtype=jnp.float32)
                  * (-math.log(10000.0) / d_model))
    pe = jnp.zeros((max_len, d_model), jnp.float32)
    pe = pe.at[:, 0::2].set(jnp.sin(pos * div))
    pe = pe.at[:, 1::2].set(jnp.cos(pos * div))
    return pe


class Seq2SeqOutput:
    """Mirrors the PyTorch Seq2SeqOutput: unpacks into 3, indexes like dec_out."""

    def __init__(self, dec_out, self_attns, cross_attns):
        self._dec_out = dec_out
        self._self_attns = self_attns
        self._cross_attns = cross_attns

    def __iter__(self):
        yield self._dec_out
        yield self._self_attns
        yield self._cross_attns

    def __getitem__(self, idx):
        if isinstance(idx, int):
            if idx == 0:
                return self._dec_out
            if idx == 1:
                return self._self_attns
            if idx == 2:
                return self._cross_attns
        return self._dec_out[idx]

    def __getattr__(self, name):
        return getattr(self._dec_out, name)


def seq2seq_forward(params, cfg, src, tgt, use_causal_mask=True):
    """Returns (dec_out, self_attns, cross_attns) as jittable arrays/tuples."""
    B, Ss = src.shape
    St = tgt.shape[1]
    D = cfg["d_model"]
    H = cfg["n_heads"]

    # Compact validity masks (True=attend) matching create_padding_mask;
    # the causal part is generated inside the attention kernel.
    src_valid = (src != cfg["pad_id"]).astype(jnp.float32)          # [B, Ss]
    tgt_valid = (tgt != cfg["pad_id"]).astype(jnp.float32)          # [B, St]

    emb = params["embedding"]   # shared encoder/decoder token embedding
    pe = params["pe"]
    scale = math.sqrt(D)

    # Encoder
    x = (emb[src] * scale + pe[:Ss][None]).astype(jnp.bfloat16)
    x2d = x.reshape(B * Ss, D)
    for lp in params["enc_layers"]:
        x2d = encoder_layer(lp, x2d, B, Ss, src_valid, H)
    mem2d = x2d

    # Decoder (output_dim is None -> output_projection is Identity -> hidden states)
    y = (emb[tgt] * scale + pe[:St][None]).astype(jnp.bfloat16)
    y2d = y.reshape(B * St, D)
    self_attns, cross_attns = [], []
    for lp in params["dec_layers"]:
        y2d, sa, ca = decoder_layer(lp, y2d, mem2d, B, St, Ss,
                                    tgt_valid, src_valid, H, use_causal_mask)
        self_attns.append(sa)
        cross_attns.append(ca)

    dec_out = y2d.reshape(B, St, D).astype(jnp.float32)
    # TODO(synk): generate() (top-k/top-p sampling loop with KV cache) not ported.
    return dec_out, tuple(self_attns), tuple(cross_attns)


# ----------------------------- Deterministic init -----------------------------

def xavier(key, shape):
    bound = math.sqrt(6.0 / (shape[0] + shape[1]))
    return jax.random.uniform(key, shape, jnp.float32, -bound, bound)


def init_params(key, cfg):
    D, F, V = cfg["d_model"], cfg["d_ff"], cfg["vocab_size"]
    keys = iter(jax.random.split(key, 256))

    def lin(din, dout):
        return xavier(next(keys), (din, dout)), jnp.zeros((dout,), jnp.float32)

    def ln():
        return jnp.ones((D,), jnp.float32), jnp.zeros((D,), jnp.float32)

    def self_attn():
        wq, bq = lin(D, D); wk, bk = lin(D, D); wv, bv = lin(D, D); wo, bo = lin(D, D)
        return {
            "sa_w_qkv": jnp.concatenate([wq, wk, wv], axis=1).astype(jnp.bfloat16),
            "sa_b_qkv": jnp.concatenate([bq, bk, bv]),
            "sa_wo": wo.astype(jnp.bfloat16),
            "sa_bo": bo,
        }

    def cross_attn():
        wq, bq = lin(D, D); wk, bk = lin(D, D); wv, bv = lin(D, D); wo, bo = lin(D, D)
        return {
            "ca_wq": wq.astype(jnp.bfloat16), "ca_bq": bq,
            "ca_w_kv": jnp.concatenate([wk, wv], axis=1).astype(jnp.bfloat16),
            "ca_b_kv": jnp.concatenate([bk, bv]),
            "ca_wo": wo.astype(jnp.bfloat16), "ca_bo": bo,
        }

    def ffn_params():
        w1, b1 = lin(D, F)
        w2, b2 = lin(F, D)
        return dict(ffn_w1=w1.astype(jnp.bfloat16), ffn_b1=b1,
                    ffn_w2=w2.astype(jnp.bfloat16), ffn_b2=b2)

    def enc_layer():
        p = {}
        p.update(self_attn())
        p.update(ffn_params())
        g1, b1 = ln(); g2, b2 = ln()
        p.update(ln1_g=g1, ln1_b=b1, ln2_g=g2, ln2_b=b2)
        return p

    def dec_layer():
        p = {}
        p.update(self_attn())
        p.update(cross_attn())
        p.update(ffn_params())
        g1, b1 = ln(); g2, b2 = ln(); g3, b3 = ln()
        p.update(ln1_g=g1, ln1_b=b1, ln2_g=g2, ln2_b=b2, ln3_g=g3, ln3_b=b3)
        return p

    return dict(
        embedding=xavier(next(keys), (V, D)),  # shared (share_embeddings=True)
        enc_layers=[enc_layer() for _ in range(cfg["n_layers"])],
        dec_layers=[dec_layer() for _ in range(cfg["n_layers"])],
        pe=sinusoidal_pe(cfg["max_len"], D),
    )


# ----------------------------- Driver -----------------------------

if __name__ == "__main__":
    cfg = dict(vocab_size=50, d_model=32, n_heads=4, d_ff=64,
               n_layers=2, max_len=64, pad_id=0)

    key = jax.random.PRNGKey(0)
    pkey, skey, tkey = jax.random.split(key, 3)
    params = init_params(pkey, cfg)

    B, Ss, St = 2, 8, 8
    src = jax.random.randint(skey, (B, Ss), 1, cfg["vocab_size"], dtype=jnp.int32)
    tgt = jax.random.randint(tkey, (B, St), 1, cfg["vocab_size"], dtype=jnp.int32)
    # Introduce padding tokens to exercise the padding masks.
    src = src.at[1, -2:].set(0)
    tgt = tgt.at[1, -1:].set(0)

    fwd = jax.jit(lambda p, s, t: seq2seq_forward(p, cfg, s, t))
    dec_out, self_attns, cross_attns = fwd(params, src, tgt)
    out = Seq2SeqOutput(dec_out, list(self_attns), list(cross_attns))

    jax.block_until_ready(dec_out)
    jax.block_until_ready(self_attns)
    jax.block_until_ready(cross_attns)

    dec_out2, self_attns2, cross_attns2 = out
    assert dec_out2.shape == (B, St, cfg["d_model"])
    assert self_attns2[0].shape == (B, cfg["n_heads"], St, St)
    assert cross_attns2[0].shape == (B, cfg["n_heads"], St, Ss)
    assert bool(jnp.all(jnp.isfinite(dec_out2)))
    assert bool(jnp.all(jnp.isfinite(self_attns2[0])))
    assert bool(jnp.all(jnp.isfinite(cross_attns2[0])))
    print("KERNEL_OK")
</pallas_src>

<mosaic_0001>
module attributes {stable_mosaic.version = 11 : i64} {
  func.func @_split_proj_kernel(%arg0: i32, %arg1: memref<16x32xbf16, #tpu.memory_space<vmem>>, %arg2: memref<32x96xbf16, #tpu.memory_space<vmem>>, %arg3: memref<1x96xf32, #tpu.memory_space<vmem>>, %arg4: memref<16x32xbf16, #tpu.memory_space<vmem>>, %arg5: memref<16x32xbf16, #tpu.memory_space<vmem>>, %arg6: memref<16x32xbf16, #tpu.memory_space<vmem>>) attributes {dimension_semantics = [#tpu.dimension_semantics<parallel>], iteration_bounds = array<i64: 1>, scalar_prefetch = 0 : i64, scratch_operands = 0 : i64, tpu.core_type = #tpu.core_type<tc>, window_params = [{transform_indices = @transform_0, window_bounds = array<i64: 16, 32>}, {pipeline_mode = #tpu.pipeline_mode<synchronous>, transform_indices = @transform_1, window_bounds = array<i64: 32, 96>}, {pipeline_mode = #tpu.pipeline_mode<synchronous>, transform_indices = @transform_2, window_bounds = array<i64: 1, 96>}, {transform_indices = @transform_3, window_bounds = array<i64: 16, 32>}, {transform_indices = @transform_4, window_bounds = array<i64: 16, 32>}, {transform_indices = @transform_5, window_bounds = array<i64: 16, 32>}]} {
    %c0 = arith.constant 0 : index
    %c0_0 = arith.constant 0 : index
    %0 = vector.load %arg1[%c0, %c0_0] : memref<16x32xbf16, #tpu.memory_space<vmem>>, vector<16x32xbf16>
    %c0_1 = arith.constant 0 : index
    %c0_2 = arith.constant 0 : index
    %1 = vector.load %arg2[%c0_1, %c0_2] : memref<32x96xbf16, #tpu.memory_space<vmem>>, vector<32x96xbf16>
    %cst = arith.constant dense<0.000000e+00> : vector<16x96xf32>
    %2 = tpu.matmul %0, %1, %cst {dimension_numbers = #tpu.dot_dimension_numbers<[1], [0], [0], [1], [0, 0, 1, 1], [], []>} : vector<16x32xbf16>, vector<32x96xbf16>, vector<16x96xf32> -> vector<16x96xf32>
    %c0_3 = arith.constant 0 : index
    %c0_4 = arith.constant 0 : index
    %3 = vector.load %arg3[%c0_3, %c0_4] : memref<1x96xf32, #tpu.memory_space<vmem>>, vector<1x96xf32>
    %4 = vector.broadcast %3 : vector<1x96xf32> to vector<16x96xf32>
    %5 = arith.addf %2, %4 : vector<16x96xf32>
    %6 = vector.extract_strided_slice %5 {offsets = [0, 0], sizes = [16, 32], strides = [1, 1]} : vector<16x96xf32> to vector<16x32xf32>
    %7 = arith.truncf %6 : vector<16x32xf32> to vector<16x32xbf16>
    %c0_5 = arith.constant 0 : index
    %c0_6 = arith.constant 0 : index
    %8 = vector.load %arg4[%c0_5, %c0_6] : memref<16x32xbf16, #tpu.memory_space<vmem>>, vector<16x32xbf16>
    tpu.vector_store %arg4[%c0_5, %c0_6], %7 {strides = array<i32>} : memref<16x32xbf16, #tpu.memory_space<vmem>>, vector<16x32xbf16>,
    %9 = vector.extract_strided_slice %5 {offsets = [0, 32], sizes = [16, 32], strides = [1, 1]} : vector<16x96xf32> to vector<16x32xf32>
    %10 = arith.truncf %9 : vector<16x32xf32> to vector<16x32xbf16>
    %c0_7 = arith.constant 0 : index
    %c0_8 = arith.constant 0 : index
    %11 = vector.load %arg5[%c0_7, %c0_8] : memref<16x32xbf16, #tpu.memory_space<vmem>>, vector<16x32xbf16>
    tpu.vector_store %arg5[%c0_7, %c0_8], %10 {strides = array<i32>} : memref<16x32xbf16, #tpu.memory_space<vmem>>, vector<16x32xbf16>,
    %12 = vector.extract_strided_slice %5 {offsets = [0, 64], sizes = [16, 32], strides = [1, 1]} : vector<16x96xf32> to vector<16x32xf32>
    %13 = arith.truncf %12 : vector<16x32xf32> to vector<16x32xbf16>
    %c0_9 = arith.constant 0 : index
    %c0_10 = arith.constant 0 : index
    %14 = vector.load %arg6[%c0_9, %c0_10] : memref<16x32xbf16, #tpu.memory_space<vmem>>, vector<16x32xbf16>
    tpu.vector_store %arg6[%c0_9, %c0_10], %13 {strides = array<i32>} : memref<16x32xbf16, #tpu.memory_space<vmem>>, vector<16x32xbf16>,
    return
  }
  func.func @transform_0(%arg0: i32) -> (i32, i32) {
    %c0_i32 = arith.constant 0 : i32
    %c0_i32_0 = arith.constant 0 : i32
    return %arg0, %c0_i32 : i32, i32
  }
  func.func @transform_1(%arg0: i32) -> (i32, i32) {
    %c0_i32 = arith.constant 0 : i32
    %c0_i32_0 = arith.constant 0 : i32
    %c0_i32_1 = arith.constant 0 : i32
    return %c0_i32, %c0_i32_0 : i32, i32
  }
  func.func @transform_2(%arg0: i32) -> (i32, i32) {
    %c0_i32 = arith.constant 0 : i32
    %c0_i32_0 = arith.constant 0 : i32
    %c0_i32_1 = arith.constant 0 : i32
    return %c0_i32, %c0_i32_0 : i32, i32
  }
  func.func @transform_3(%arg0: i32) -> (i32, i32) {
    %c0_i32 = arith.constant 0 : i32
    %c0_i32_0 = arith.constant 0 : i32
    return %arg0, %c0_i32 : i32, i32
  }
  func.func @transform_4(%arg0: i32) -> (i32, i32) {
    %c0_i32 = arith.constant 0 : i32
    %c0_i32_0 = arith.constant 0 : i32
    return %arg0, %c0_i32 : i32, i32
  }
  func.func @transform_5(%arg0: i32) -> (i32, i32) {
    %c0_i32 = arith.constant 0 : i32
    %c0_i32_0 = arith.constant 0 : i32
    return %arg0, %c0_i32 : i32, i32
  }
}

module attributes {stable_mosaic.version = 11 : i64} {
  func.func @_attn_kernel(%arg0: i32, %arg1: i32, %arg2: memref<2x8xf32, #tpu.memory_space<vmem>>, %arg3: memref<1x1x8x8xbf16, #tpu.memory_space<vmem>>, %arg4: memref<1x1x8x8xbf16, #tpu.memory_space<vmem>>, %arg5: memref<1x1x8x8xbf16, #tpu.memory_space<vmem>>, %arg6: memref<1x1x8x8xbf16, #tpu.memory_space<vmem>>) attributes {dimension_semantics = [#tpu.dimension_semantics<parallel>, #tpu.dimension_semantics<parallel>], iteration_bounds = array<i64: 2, 4>, scalar_prefetch = 0 : i64, scratch_operands = 0 : i64, tpu.core_type = #tpu.core_type<tc>, window_params = [{pipeline_mode = #tpu.pipeline_mode<synchronous>, transform_indices = @transform_0, window_bounds = array<i64: 2, 8>}, {transform_indices = @transform_1, window_bounds = array<i64: 1, 1, 8, 8>}, {transform_indices = @transform_2, window_bounds = array<i64: 1, 1, 8, 8>}, {transform_indices = @transform_3, window_bounds = array<i64: 1, 1, 8, 8>}, {transform_indices = @transform_4, window_bounds = array<i64: 1, 1, 8, 8>}]} {
    %c0 = arith.constant 0 : index
    %c0_0 = arith.constant 0 : index
    %c0_1 = arith.constant 0 : index
    %c0_2 = arith.constant 0 : index
    %0 = vector.load %arg3[%c0, %c0_0, %c0_1, %c0_2] : memref<1x1x8x8xbf16, #tpu.memory_space<vmem>>, vector<1x1x8x8xbf16>
    %1 = vector.shape_cast %0 : vector<1x1x8x8xbf16> to vector<8x8xbf16>
    %c0_3 = arith.constant 0 : index
    %c0_4 = arith.constant 0 : index
    %c0_5 = arith.constant 0 : index
    %c0_6 = arith.constant 0 : index
    %2 = vector.load %arg4[%c0_3, %c0_4, %c0_5, %c0_6] : memref<1x1x8x8xbf16, #tpu.memory_space<vmem>>, vector<1x1x8x8xbf16>
    %3 = vector.shape_cast %2 : vector<1x1x8x8xbf16> to vector<8x8xbf16>
    %c0_7 = arith.constant 0 : index
    %c0_8 = arith.constant 0 : index
    %c0_9 = arith.constant 0 : index
    %c0_10 = arith.constant 0 : index
    %4 = vector.load %arg5[%c0_7, %c0_8, %c0_9, %c0_10] : memref<1x1x8x8xbf16, #tpu.memory_space<vmem>>, vector<1x1x8x8xbf16>
    %5 = vector.shape_cast %4 : vector<1x1x8x8xbf16> to vector<8x8xbf16>
    %cst = arith.constant dense<0.000000e+00> : vector<8x8xf32>
    %6 = tpu.matmul %1, %3, %cst {dimension_numbers = #tpu.dot_dimension_numbers<[1], [1], [0], [0], [0, 0, 1, 0], [], []>} : vector<8x8xbf16>, vector<8x8xbf16>, vector<8x8xf32> -> vector<8x8xf32>
    %cst_11 = arith.constant 0.353553385 : f32
    %7 = vector.broadcast %cst_11 : f32 to vector<8x8xf32>
    %8 = arith.mulf %6, %7 : vector<8x8xf32>
    %9 = arith.index_cast %arg0 : i32 to index
    %c0_12 = arith.constant 0 : index
    %10 = vector.load %arg2[%9, %c0_12] : memref<2x8xf32, #tpu.memory_space<vmem>>, vector<1x8xf32>
    %cst_13 = arith.constant 5.000000e-01 : f32
    %11 = vector.broadcast %cst_13 : f32 to vector<1x8xf32>
    %12 = arith.cmpf ogt, %10, %11 : vector<1x8xf32>
    %cst_14 = arith.constant -1.000000e+09 : f32
    %13 = vector.shape_cast %12 : vector<1x8xi1> to vector<1x8xi1>
    %14 = vector.broadcast %13 : vector<1x8xi1> to vector<8x8xi1>
    %15 = vector.broadcast %cst_14 : f32 to vector<8x8xf32>
    %16 = arith.select %14, %8, %15 : vector<8x8xi1>, vector<8x8xf32>
    %cst_15 = arith.constant dense<0xFF800000> : vector<8xf32>
    %17 = vector.multi_reduction <maximumf>, %16, %cst_15 [1] : vector<8x8xf32> to vector<8xf32>
    %18 = vector.shape_cast %17 : vector<8xf32> to vector<8x1xf32>
    %19 = vector.broadcast %18 : vector<8x1xf32> to vector<8x8xf32>
    %20 = arith.subf %16, %19 : vector<8x8xf32>
    %21 = math.exp %20 : vector<8x8xf32>
    %cst_16 = arith.constant dense<0.000000e+00> : vector<8xf32>
    %22 = vector.multi_reduction <add>, %21, %cst_16 [1] : vector<8x8xf32> to vector<8xf32>
    %23 = vector.shape_cast %22 : vector<8xf32> to vector<8x1xf32>
    %24 = vector.broadcast %23 : vector<8x1xf32> to vector<8x8xf32>
    %25 = arith.divf %21, %24 : vector<8x8xf32>
    %26 = arith.truncf %25 : vector<8x8xf32> to vector<8x8xbf16>
    %cst_17 = arith.constant dense<0.000000e+00> : vector<8x8xf32>
    %27 = tpu.matmul %26, %5, %cst_17 {dimension_numbers = #tpu.dot_dimension_numbers<[1], [0], [0], [1], [0, 0, 1, 1], [], []>} : vector<8x8xbf16>, vector<8x8xbf16>, vector<8x8xf32> -> vector<8x8xf32>
    %28 = vector.shape_cast %27 : vector<8x8xf32> to vector<1x1x8x8xf32>
    %29 = arith.truncf %28 : vector<1x1x8x8xf32> to vector<1x1x8x8xbf16>
    %c0_18 = arith.constant 0 : index
    %c0_19 = arith.constant 0 : index
    %c0_20 = arith.constant 0 : index
    %c0_21 = arith.constant 0 : index
    %30 = vector.load %arg6[%c0_18, %c0_19, %c0_20, %c0_21] : memref<1x1x8x8xbf16, #tpu.memory_space<vmem>>, vector<1x1x8x8xbf16>
    tpu.vector_store %arg6[%c0_18, %c0_19, %c0_20, %c0_21], %29 {strides = array<i32>} : memref<1x1x8x8xbf16, #tpu.memory_space<vmem>>, vector<1x1x8x8xbf16>,
    return
  }
  func.func @transform_0(%arg0: i32, %arg1: i32) -> (i32, i32) {
    %c0_i32 = arith.constant 0 : i32
    %c0_i32_0 = arith.constant 0 : i32
    %c0_i32_1 = arith.constant 0 : i32
    return %c0_i32, %c0_i32_0 : i32, i32
  }
  func.func @transform_1(%arg0: i32, %arg1: i32) -> (i32, i32, i32, i32) {
    %c0_i32 = arith.constant 0 : i32
    %c0_i32_0 = arith.constant 0 : i32
    %c0_i32_1 = arith.constant 0 : i32
    return %arg0, %arg1, %c0_i32, %c0_i32_0 : i32, i32, i32, i32
  }
  func.func @transform_2(%arg0: i32, %arg1: i32) -> (i32, i32, i32, i32) {
    %c0_i32 = arith.constant 0 : i32
    %c0_i32_0 = arith.constant 0 : i32
    %c0_i32_1 = arith.constant 0 : i32
    return %arg0, %arg1, %c0_i32, %c0_i32_0 : i32, i32, i32, i32
  }
  func.func @transform_3(%arg0: i32, %arg1: i32) -> (i32, i32, i32, i32) {
    %c0_i32 = arith.constant 0 : i32
    %c0_i32_0 = arith.constant 0 : i32
    %c0_i32_1 = arith.constant 0 : i32
    return %arg0, %arg1, %c0_i32, %c0_i32_0 : i32, i32, i32, i32
  }
  func.func @transform_4(%arg0: i32, %arg1: i32) -> (i32, i32, i32, i32) {
    %c0_i32 = arith.constant 0 : i32
    %c0_i32_0 = arith.constant 0 : i32
    %c0_i32_1 = arith.constant 0 : i32
    return %arg0, %arg1, %c0_i32, %c0_i32_0 : i32, i32, i32, i32
  }
}

module attributes {stable_mosaic.version = 11 : i64} {
  func.func @_proj_res_ln_kernel(%arg0: i32, %arg1: memref<16x32xbf16, #tpu.memory_space<vmem>>, %arg2: memref<32x32xbf16, #tpu.memory_space<vmem>>, %arg3: memref<1x32xf32, #tpu.memory_space<vmem>>, %arg4: memref<16x32xbf16, #tpu.memory_space<vmem>>, %arg5: memref<1x32xf32, #tpu.memory_space<vmem>>, %arg6: memref<1x32xf32, #tpu.memory_space<vmem>>, %arg7: memref<16x32xbf16, #tpu.memory_space<vmem>>) attributes {dimension_semantics = [#tpu.dimension_semantics<parallel>], iteration_bounds = array<i64: 1>, scalar_prefetch = 0 : i64, scratch_operands = 0 : i64, tpu.core_type = #tpu.core_type<tc>, window_params = [{transform_indices = @transform_0, window_bounds = array<i64: 16, 32>}, {pipeline_mode = #tpu.pipeline_mode<synchronous>, transform_indices = @transform_1, window_bounds = array<i64: 32, 32>}, {pipeline_mode = #tpu.pipeline_mode<synchronous>, transform_indices = @transform_2, window_bounds = array<i64: 1, 32>}, {transform_indices = @transform_3, window_bounds = array<i64: 16, 32>}, {pipeline_mode = #tpu.pipeline_mode<synchronous>, transform_indices = @transform_4, window_bounds = array<i64: 1, 32>}, {pipeline_mode = #tpu.pipeline_mode<synchronous>, transform_indices = @transform_5, window_bounds = array<i64: 1, 32>}, {transform_indices = @transform_6, window_bounds = array<i64: 16, 32>}]} {
    %c0 = arith.constant 0 : index
    %c0_0 = arith.constant 0 : index
    %0 = vector.load %arg1[%c0, %c0_0] : memref<16x32xbf16, #tpu.memory_space<vmem>>, vector<16x32xbf16>
    %c0_1 = arith.constant 0 : index
    %c0_2 = arith.constant 0 : index
    %1 = vector.load %arg2[%c0_1, %c0_2] : memref<32x32xbf16, #tpu.memory_space<vmem>>, vector<32x32xbf16>
    %cst = arith.constant dense<0.000000e+00> : vector<16x32xf32>
    %2 = tpu.matmul %0, %1, %cst {dimension_numbers = #tpu.dot_dimension_numbers<[1], [0], [0], [1], [0, 0, 1, 1], [], []>} : vector<16x32xbf16>, vector<32x32xbf16>, vector<16x32xf32> -> vector<16x32xf32>
    %c0_3 = arith.constant 0 : index
    %c0_4 = arith.constant 0 : index
    %3 = vector.load %arg3[%c0_3, %c0_4] : memref<1x32xf32, #tpu.memory_space<vmem>>, vector<1x32xf32>
    %4 = vector.broadcast %3 : vector<1x32xf32> to vector<16x32xf32>
    %5 = arith.addf %2, %4 : vector<16x32xf32>
    %c0_5 = arith.constant 0 : index
    %c0_6 = arith.constant 0 : index
    %6 = vector.load %arg4[%c0_5, %c0_6] : memref<16x32xbf16, #tpu.memory_space<vmem>>, vector<16x32xbf16>
    %7 = arith.extf %6 : vector<16x32xbf16> to vector<16x32xf32>
    %8 = arith.addf %5, %7 : vector<16x32xf32>
    %c0_7 = arith.constant 0 : index
    %c0_8 = arith.constant 0 : index
    %9 = vector.load %arg5[%c0_7, %c0_8] : memref<1x32xf32, #tpu.memory_space<vmem>>, vector<1x32xf32>
    %c0_9 = arith.constant 0 : index
    %c0_10 = arith.constant 0 : index
    %10 = vector.load %arg6[%c0_9, %c0_10] : memref<1x32xf32, #tpu.memory_space<vmem>>, vector<1x32xf32>
    %cst_11 = arith.constant dense<0.000000e+00> : vector<16xf32>
    %11 = vector.multi_reduction <add>, %8, %cst_11 [1] : vector<16x32xf32> to vector<16xf32>
    %12 = vector.shape_cast %11 : vector<16xf32> to vector<16x1xf32>
    %cst_12 = arith.constant 3.200000e+01 : f32
    %13 = vector.broadcast %cst_12 : f32 to vector<16x1xf32>
    %14 = arith.divf %12, %13 : vector<16x1xf32>
    %15 = vector.broadcast %14 : vector<16x1xf32> to vector<16x32xf32>
    %16 = arith.subf %8, %15 : vector<16x32xf32>
    %17 = arith.mulf %16, %16 : vector<16x32xf32>
    %cst_13 = arith.constant dense<0.000000e+00> : vector<16xf32>
    %18 = vector.multi_reduction <add>, %17, %cst_13 [1] : vector<16x32xf32> to vector<16xf32>
    %19 = vector.shape_cast %18 : vector<16xf32> to vector<16x1xf32>
    %cst_14 = arith.constant 3.200000e+01 : f32
    %20 = vector.broadcast %cst_14 : f32 to vector<16x1xf32>
    %21 = arith.divf %19, %20 : vector<16x1xf32>
    %22 = vector.broadcast %14 : vector<16x1xf32> to vector<16x32xf32>
    %23 = arith.subf %8, %22 : vector<16x32xf32>
    %cst_15 = arith.constant 9.99999974E-6 : f32
    %24 = vector.broadcast %cst_15 : f32 to vector<16x1xf32>
    %25 = arith.addf %21, %24 : vector<16x1xf32>
    %26 = math.rsqrt %25 : vector<16x1xf32>
    %27 = vector.broadcast %26 : vector<16x1xf32> to vector<16x32xf32>
    %28 = arith.mulf %23, %27 : vector<16x32xf32>
    %29 = vector.broadcast %9 : vector<1x32xf32> to vector<16x32xf32>
    %30 = arith.mulf %28, %29 : vector<16x32xf32>
    %31 = vector.broadcast %10 : vector<1x32xf32> to vector<16x32xf32>
    %32 = arith.addf %30, %31 : vector<16x32xf32>
    %33 = arith.truncf %32 : vector<16x32xf32> to vector<16x32xbf16>
    %c0_16 = arith.constant 0 : index
    %c0_17 = arith.constant 0 : index
    %34 = vector.load %arg7[%c0_16, %c0_17] : memref<16x32xbf16, #tpu.memory_space<vmem>>, vector<16x32xbf16>
    tpu.vector_store %arg7[%c0_16, %c0_17], %33 {strides = array<i32>} : memref<16x32xbf16, #tpu.memory_space<vmem>>, vector<16x32xbf16>,
    return
  }
  func.func @transform_0(%arg0: i32) -> (i32, i32) {
    %c0_i32 = arith.constant 0 : i32
    %c0_i32_0 = arith.constant 0 : i32
    return %arg0, %c0_i32 : i32, i32
  }
  func.func @transform_1(%arg0: i32) -> (i32, i32) {
    %c0_i32 = arith.constant 0 : i32
    %c0_i32_0 = arith.constant 0 : i32
    %c0_i32_1 = arith.constant 0 : i32
    return %c0_i32, %c0_i32_0 : i32, i32
  }
  func.func @transform_2(%arg0: i32) -> (i32, i32) {
    %c0_i32 = arith.constant 0 : i32
    %c0_i32_0 = arith.constant 0 : i32
    %c0_i32_1 = arith.constant 0 : i32
    return %c0_i32, %c0_i32_0 : i32, i32
  }
  func.func @transform_3(%arg0: i32) -> (i32, i32) {
    %c0_i32 = arith.constant 0 : i32
    %c0_i32_0 = arith.constant 0 : i32
    return %arg0, %c0_i32 : i32, i32
  }
  func.func @transform_4(%arg0: i32) -> (i32, i32) {
    %c0_i32 = arith.constant 0 : i32
    %c0_i32_0 = arith.constant 0 : i32
    %c0_i32_1 = arith.constant 0 : i32
    return %c0_i32, %c0_i32_0 : i32, i32
  }
  func.func @transform_5(%arg0: i32) -> (i32, i32) {
    %c0_i32 = arith.constant 0 : i32
    %c0_i32_0 = arith.constant 0 : i32
    %c0_i32_1 = arith.constant 0 : i32
    return %c0_i32, %c0_i32_0 : i32, i32
  }
  func.func @transform_6(%arg0: i32) -> (i32, i32) {
    %c0_i32 = arith.constant 0 : i32
    %c0_i32_0 = arith.constant 0 : i32
    return %arg0, %c0_i32 : i32, i32
  }
}

module attributes {stable_mosaic.version = 11 : i64} {
  func.func @_ffn_res_ln_kernel(%arg0: i32, %arg1: i32, %arg2: memref<16x32xbf16, #tpu.memory_space<vmem>>, %arg3: memref<32x64xbf16, #tpu.memory_space<vmem>>, %arg4: memref<1x64xf32, #tpu.memory_space<vmem>>, %arg5: memref<64x32xbf16, #tpu.memory_space<vmem>>, %arg6: memref<1x32xf32, #tpu.memory_space<vmem>>, %arg7: memref<1x32xf32, #tpu.memory_space<vmem>>, %arg8: memref<1x32xf32, #tpu.memory_space<vmem>>, %arg9: memref<16x32xbf16, #tpu.memory_space<vmem>>, %arg10: memref<16x32xf32, #tpu.memory_space<vmem>>) attributes {dimension_semantics = [#tpu.dimension_semantics<parallel>, #tpu.dimension_semantics<arbitrary>], iteration_bounds = array<i64: 1, 1>, scalar_prefetch = 0 : i64, scratch_operands = 1 : i64, tpu.core_type = #tpu.core_type<tc>, window_params = [{transform_indices = @transform_0, window_bounds = array<i64: 16, 32>}, {transform_indices = @transform_1, window_bounds = array<i64: 32, 64>}, {transform_indices = @transform_2, window_bounds = array<i64: 1, 64>}, {transform_indices = @transform_3, window_bounds = array<i64: 64, 32>}, {pipeline_mode = #tpu.pipeline_mode<synchronous>, transform_indices = @transform_4, window_bounds = array<i64: 1, 32>}, {pipeline_mode = #tpu.pipeline_mode<synchronous>, transform_indices = @transform_5, window_bounds = array<i64: 1, 32>}, {pipeline_mode = #tpu.pipeline_mode<synchronous>, transform_indices = @transform_6, window_bounds = array<i64: 1, 32>}, {transform_indices = @transform_7, window_bounds = array<i64: 16, 32>}]} {
    %c0_i32 = arith.constant 0 : i32
    %0 = arith.cmpi eq, %arg1, %c0_i32 : i32
    %1 = arith.extui %0 : i1 to i32
    %c0_i32_0 = arith.constant 0 : i32
    %2 = arith.cmpi ne, %1, %c0_i32_0 : i32
    scf.if %2 {
      %cst_16 = arith.constant 0.000000e+00 : f32
      %20 = vector.broadcast %cst_16 : f32 to vector<16x32xf32>
      %c0_17 = arith.constant 0 : index
      %c0_18 = arith.constant 0 : index
      %21 = vector.load %arg10[%c0_17, %c0_18] : memref<16x32xf32, #tpu.memory_space<vmem>>, vector<16x32xf32>
      tpu.vector_store %arg10[%c0_17, %c0_18], %20 {strides = array<i32>} : memref<16x32xf32, #tpu.memory_space<vmem>>, vector<16x32xf32>,
    } else {
    }
    %c0 = arith.constant 0 : index
    %c0_1 = arith.constant 0 : index
    %3 = vector.load %arg2[%c0, %c0_1] : memref<16x32xbf16, #tpu.memory_space<vmem>>, vector<16x32xbf16>
    %c0_2 = arith.constant 0 : index
    %c0_3 = arith.constant 0 : index
    %4 = vector.load %arg3[%c0_2, %c0_3] : memref<32x64xbf16, #tpu.memory_space<vmem>>, vector<32x64xbf16>
    %cst = arith.constant dense<0.000000e+00> : vector<16x64xf32>
    %5 = tpu.matmul %3, %4, %cst {dimension_numbers = #tpu.dot_dimension_numbers<[1], [0], [0], [1], [0, 0, 1, 1], [], []>} : vector<16x32xbf16>, vector<32x64xbf16>, vector<16x64xf32> -> vector<16x64xf32>
    %c0_4 = arith.constant 0 : index
    %c0_5 = arith.constant 0 : index
    %6 = vector.load %arg4[%c0_4, %c0_5] : memref<1x64xf32, #tpu.memory_space<vmem>>, vector<1x64xf32>
    %7 = vector.broadcast %6 : vector<1x64xf32> to vector<16x64xf32>
    %8 = arith.addf %5, %7 : vector<16x64xf32>
    %cst_6 = arith.constant 0.000000e+00 : f32
    %9 = vector.broadcast %cst_6 : f32 to vector<16x64xf32>
    %10 = arith.maximumf %8, %9 : vector<16x64xf32>
    %c0_7 = arith.constant 0 : index
    %c0_8 = arith.constant 0 : index
    %11 = vector.load %arg10[%c0_7, %c0_8] : memref<16x32xf32, #tpu.memory_space<vmem>>, vector<16x32xf32>
    %12 = arith.truncf %10 : vector<16x64xf32> to vector<16x64xbf16>
    %c0_9 = arith.constant 0 : index
    %c0_10 = arith.constant 0 : index
    %13 = vector.load %arg5[%c0_9, %c0_10] : memref<64x32xbf16, #tpu.memory_space<vmem>>, vector<64x32xbf16>
    %cst_11 = arith.constant dense<0.000000e+00> : vector<16x32xf32>
    %14 = tpu.matmul %12, %13, %cst_11 {dimension_numbers = #tpu.dot_dimension_numbers<[1], [0], [0], [1], [0, 0, 1, 1], [], []>} : vector<16x64xbf16>, vector<64x32xbf16>, vector<16x32xf32> -> vector<16x32xf32>
    %15 = arith.addf %11, %14 : vector<16x32xf32>
    %c0_12 = arith.constant 0 : index
    %c0_13 = arith.constant 0 : index
    %16 = vector.load %arg10[%c0_12, %c0_13] : memref<16x32xf32, #tpu.memory_space<vmem>>, vector<16x32xf32>
    tpu.vector_store %arg10[%c0_12, %c0_13], %15 {strides = array<i32>} : memref<16x32xf32, #tpu.memory_space<vmem>>, vector<16x32xf32>,
    %c0_i32_14 = arith.constant 0 : i32
    %17 = arith.cmpi eq, %arg1, %c0_i32_14 : i32
    %18 = arith.extui %17 : i1 to i32
    %c0_i32_15 = arith.constant 0 : i32
    %19 = arith.cmpi ne, %18, %c0_i32_15 : i32
    scf.if %19 {
      %c0_16 = arith.constant 0 : index
      %c0_17 = arith.constant 0 : index
      %20 = vector.load %arg10[%c0_16, %c0_17] : memref<16x32xf32, #tpu.memory_space<vmem>>, vector<16x32xf32>
      %c0_18 = arith.constant 0 : index
      %c0_19 = arith.constant 0 : index
      %21 = vector.load %arg6[%c0_18, %c0_19] : memref<1x32xf32, #tpu.memory_space<vmem>>, vector<1x32xf32>
      %22 = vector.broadcast %21 : vector<1x32xf32> to vector<16x32xf32>
      %23 = arith.addf %20, %22 : vector<16x32xf32>
      %24 = arith.extf %3 : vector<16x32xbf16> to vector<16x32xf32>
      %25 = arith.addf %23, %24 : vector<16x32xf32>
      %c0_20 = arith.constant 0 : index
      %c0_21 = arith.constant 0 : index
      %26 = vector.load %arg7[%c0_20, %c0_21] : memref<1x32xf32, #tpu.memory_space<vmem>>, vector<1x32xf32>
      %c0_22 = arith.constant 0 : index
      %c0_23 = arith.constant 0 : index
      %27 = vector.load %arg8[%c0_22, %c0_23] : memref<1x32xf32, #tpu.memory_space<vmem>>, vector<1x32xf32>
      %cst_24 = arith.constant dense<0.000000e+00> : vector<16xf32>
      %28 = vector.multi_reduction <add>, %25, %cst_24 [1] : vector<16x32xf32> to vector<16xf32>
      %29 = vector.shape_cast %28 : vector<16xf32> to vector<16x1xf32>
      %cst_25 = arith.constant 3.200000e+01 : f32
      %30 = vector.broadcast %cst_25 : f32 to vector<16x1xf32>
      %31 = arith.divf %29, %30 : vector<16x1xf32>
      %32 = vector.broadcast %31 : vector<16x1xf32> to vector<16x32xf32>
      %33 = arith.subf %25, %32 : vector<16x32xf32>
      %34 = arith.mulf %33, %33 : vector<16x32xf32>
      %cst_26 = arith.constant dense<0.000000e+00> : vector<16xf32>
      %35 = vector.multi_reduction <add>, %34, %cst_26 [1] : vector<16x32xf32> to vector<16xf32>
      %36 = vector.shape_cast %35 : vector<16xf32> to vector<16x1xf32>
      %cst_27 = arith.constant 3.200000e+01 : f32
      %37 = vector.broadcast %cst_27 : f32 to vector<16x1xf32>
      %38 = arith.divf %36, %37 : vector<16x1xf32>
      %39 = vector.broadcast %31 : vector<16x1xf32> to vector<16x32xf32>
      %40 = arith.subf %25, %39 : vector<16x32xf32>
      %cst_28 = arith.constant 9.99999974E-6 : f32
      %41 = vector.broadcast %cst_28 : f32 to vector<16x1xf32>
      %42 = arith.addf %38, %41 : vector<16x1xf32>
      %43 = math.rsqrt %42 : vector<16x1xf32>
      %44 = vector.broadcast %43 : vector<16x1xf32> to vector<16x32xf32>
      %45 = arith.mulf %40, %44 : vector<16x32xf32>
      %46 = vector.broadcast %26 : vector<1x32xf32> to vector<16x32xf32>
      %47 = arith.mulf %45, %46 : vector<16x32xf32>
      %48 = vector.broadcast %27 : vector<1x32xf32> to vector<16x32xf32>
      %49 = arith.addf %47, %48 : vector<16x32xf32>
      %50 = arith.truncf %49 : vector<16x32xf32> to vector<16x32xbf16>
      %c0_29 = arith.constant 0 : index
      %c0_30 = arith.constant 0 : index
      %51 = vector.load %arg9[%c0_29, %c0_30] : memref<16x32xbf16, #tpu.memory_space<vmem>>, vector<16x32xbf16>
      tpu.vector_store %arg9[%c0_29, %c0_30], %50 {strides = array<i32>} : memref<16x32xbf16, #tpu.memory_space<vmem>>, vector<16x32xbf16>,
    } else {
    }
    return
  }
  func.func @transform_0(%arg0: i32, %arg1: i32) -> (i32, i32) {
    %c0_i32 = arith.constant 0 : i32
    %c0_i32_0 = arith.constant 0 : i32
    return %arg0, %c0_i32 : i32, i32
  }
  func.func @transform_1(%arg0: i32, %arg1: i32) -> (i32, i32) {
    %c0_i32 = arith.constant 0 : i32
    %c0_i32_0 = arith.constant 0 : i32
    return %c0_i32, %arg1 : i32, i32
  }
  func.func @transform_2(%arg0: i32, %arg1: i32) -> (i32, i32) {
    %c0_i32 = arith.constant 0 : i32
    %c0_i32_0 = arith.constant 0 : i32
    return %c0_i32, %arg1 : i32, i32
  }
  func.func @transform_3(%arg0: i32, %arg1: i32) -> (i32, i32) {
    %c0_i32 = arith.constant 0 : i32
    %c0_i32_0 = arith.constant 0 : i32
    return %arg1, %c0_i32 : i32, i32
  }
  func.func @transform_4(%arg0: i32, %arg1: i32) -> (i32, i32) {
    %c0_i32 = arith.constant 0 : i32
    %c0_i32_0 = arith.constant 0 : i32
    %c0_i32_1 = arith.constant 0 : i32
    return %c0_i32, %c0_i32_0 : i32, i32
  }
  func.func @transform_5(%arg0: i32, %arg1: i32) -> (i32, i32) {
    %c0_i32 = arith.constant 0 : i32
    %c0_i32_0 = arith.constant 0 : i32
    %c0_i32_1 = arith.constant 0 : i32
    return %c0_i32, %c0_i32_0 : i32, i32
  }
  func.func @transform_6(%arg0: i32, %arg1: i32) -> (i32, i32) {
    %c0_i32 = arith.constant 0 : i32
    %c0_i32_0 = arith.constant 0 : i32
    %c0_i32_1 = arith.constant 0 : i32
    return %c0_i32, %c0_i32_0 : i32, i32
  }
  func.func @transform_7(%arg0: i32, %arg1: i32) -> (i32, i32) {
    %c0_i32 = arith.constant 0 : i32
    %c0_i32_0 = arith.constant 0 : i32
    return %arg0, %c0_i32 : i32, i32
  }
}

module attributes {stable_mosaic.version = 11 : i64} {
  func.func @_split_proj_kernel(%arg0: i32, %arg1: memref<16x32xbf16, #tpu.memory_space<vmem>>, %arg2: memref<32x64xbf16, #tpu.memory_space<vmem>>, %arg3: memref<1x64xf32, #tpu.memory_space<vmem>>, %arg4: memref<16x32xbf16, #tpu.memory_space<vmem>>, %arg5: memref<16x32xbf16, #tpu.memory_space<vmem>>) attributes {dimension_semantics = [#tpu.dimension_semantics<parallel>], iteration_bounds = array<i64: 1>, scalar_prefetch = 0 : i64, scratch_operands = 0 : i64, tpu.core_type = #tpu.core_type<tc>, window_params = [{transform_indices = @transform_0, window_bounds = array<i64: 16, 32>}, {pipeline_mode = #tpu.pipeline_mode<synchronous>, transform_indices = @transform_1, window_bounds = array<i64: 32, 64>}, {pipeline_mode = #tpu.pipeline_mode<synchronous>, transform_indices = @transform_2, window_bounds = array<i64: 1, 64>}, {transform_indices = @transform_3, window_bounds = array<i64: 16, 32>}, {transform_indices = @transform_4, window_bounds = array<i64: 16, 32>}]} {
    %c0 = arith.constant 0 : index
    %c0_0 = arith.constant 0 : index
    %0 = vector.load %arg1[%c0, %c0_0] : memref<16x32xbf16, #tpu.memory_space<vmem>>, vector<16x32xbf16>
    %c0_1 = arith.constant 0 : index
    %c0_2 = arith.constant 0 : index
    %1 = vector.load %arg2[%c0_1, %c0_2] : memref<32x64xbf16, #tpu.memory_space<vmem>>, vector<32x64xbf16>
    %cst = arith.constant dense<0.000000e+00> : vector<16x64xf32>
    %2 = tpu.matmul %0, %1, %cst {dimension_numbers = #tpu.dot_dimension_numbers<[1], [0], [0], [1], [0, 0, 1, 1], [], []>} : vector<16x32xbf16>, vector<32x64xbf16>, vector<16x64xf32> -> vector<16x64xf32>
    %c0_3 = arith.constant 0 : index
    %c0_4 = arith.constant 0 : index
    %3 = vector.load %arg3[%c0_3, %c0_4] : memref<1x64xf32, #tpu.memory_space<vmem>>, vector<1x64xf32>
    %4 = vector.broadcast %3 : vector<1x64xf32> to vector<16x64xf32>
    %5 = arith.addf %2, %4 : vector<16x64xf32>
    %6 = vector.extract_strided_slice %5 {offsets = [0, 0], sizes = [16, 32], strides = [1, 1]} : vector<16x64xf32> to vector<16x32xf32>
    %7 = arith.truncf %6 : vector<16x32xf32> to vector<16x32xbf16>
    %c0_5 = arith.constant 0 : index
    %c0_6 = arith.constant 0 : index
    %8 = vector.load %arg4[%c0_5, %c0_6] : memref<16x32xbf16, #tpu.memory_space<vmem>>, vector<16x32xbf16>
    tpu.vector_store %arg4[%c0_5, %c0_6], %7 {strides = array<i32>} : memref<16x32xbf16, #tpu.memory_space<vmem>>, vector<16x32xbf16>,
    %9 = vector.extract_strided_slice %5 {offsets = [0, 32], sizes = [16, 32], strides = [1, 1]} : vector<16x64xf32> to vector<16x32xf32>
    %10 = arith.truncf %9 : vector<16x32xf32> to vector<16x32xbf16>
    %c0_7 = arith.constant 0 : index
    %c0_8 = arith.constant 0 : index
    %11 = vector.load %arg5[%c0_7, %c0_8] : memref<16x32xbf16, #tpu.memory_space<vmem>>, vector<16x32xbf16>
    tpu.vector_store %arg5[%c0_7, %c0_8], %10 {strides = array<i32>} : memref<16x32xbf16, #tpu.memory_space<vmem>>, vector<16x32xbf16>,
    return
  }
  func.func @transform_0(%arg0: i32) -> (i32, i32) {
    %c0_i32 = arith.constant 0 : i32
    %c0_i32_0 = arith.constant 0 : i32
    return %arg0, %c0_i32 : i32, i32
  }
  func.func @transform_1(%arg0: i32) -> (i32, i32) {
    %c0_i32 = arith.constant 0 : i32
    %c0_i32_0 = arith.constant 0 : i32
    %c0_i32_1 = arith.constant 0 : i32
    return %c0_i32, %c0_i32_0 : i32, i32
  }
  func.func @transform_2(%arg0: i32) -> (i32, i32) {
    %c0_i32 = arith.constant 0 : i32
    %c0_i32_0 = arith.constant 0 : i32
    %c0_i32_1 = arith.constant 0 : i32
    return %c0_i32, %c0_i32_0 : i32, i32
  }
  func.func @transform_3(%arg0: i32) -> (i32, i32) {
    %c0_i32 = arith.constant 0 : i32
    %c0_i32_0 = arith.constant 0 : i32
    return %arg0, %c0_i32 : i32, i32
  }
  func.func @transform_4(%arg0: i32) -> (i32, i32) {
    %c0_i32 = arith.constant 0 : i32
    %c0_i32_0 = arith.constant 0 : i32
    return %arg0, %c0_i32 : i32, i32
  }
}

module attributes {stable_mosaic.version = 11 : i64} {
  func.func @_attn_kernel(%arg0: i32, %arg1: i32, %arg2: memref<2x8xf32, #tpu.memory_space<vmem>>, %arg3: memref<1x1x8x8xbf16, #tpu.memory_space<vmem>>, %arg4: memref<1x1x8x8xbf16, #tpu.memory_space<vmem>>, %arg5: memref<1x1x8x8xbf16, #tpu.memory_space<vmem>>, %arg6: memref<1x1x8x8xbf16, #tpu.memory_space<vmem>>, %arg7: memref<1x1x8x8xf32, #tpu.memory_space<vmem>>) attributes {dimension_semantics = [#tpu.dimension_semantics<parallel>, #tpu.dimension_semantics<parallel>], iteration_bounds = array<i64: 2, 4>, scalar_prefetch = 0 : i64, scratch_operands = 0 : i64, tpu.core_type = #tpu.core_type<tc>, window_params = [{pipeline_mode = #tpu.pipeline_mode<synchronous>, transform_indices = @transform_0, window_bounds = array<i64: 2, 8>}, {transform_indices = @transform_1, window_bounds = array<i64: 1, 1, 8, 8>}, {transform_indices = @transform_2, window_bounds = array<i64: 1, 1, 8, 8>}, {transform_indices = @transform_3, window_bounds = array<i64: 1, 1, 8, 8>}, {transform_indices = @transform_4, window_bounds = array<i64: 1, 1, 8, 8>}, {transform_indices = @transform_5, window_bounds = array<i64: 1, 1, 8, 8>}]} {
    %c0 = arith.constant 0 : index
    %c0_0 = arith.constant 0 : index
    %c0_1 = arith.constant 0 : index
    %c0_2 = arith.constant 0 : index
    %0 = vector.load %arg3[%c0, %c0_0, %c0_1, %c0_2] : memref<1x1x8x8xbf16, #tpu.memory_space<vmem>>, vector<1x1x8x8xbf16>
    %1 = vector.shape_cast %0 : vector<1x1x8x8xbf16> to vector<8x8xbf16>
    %c0_3 = arith.constant 0 : index
    %c0_4 = arith.constant 0 : index
    %c0_5 = arith.constant 0 : index
    %c0_6 = arith.constant 0 : index
    %2 = vector.load %arg4[%c0_3, %c0_4, %c0_5, %c0_6] : memref<1x1x8x8xbf16, #tpu.memory_space<vmem>>, vector<1x1x8x8xbf16>
    %3 = vector.shape_cast %2 : vector<1x1x8x8xbf16> to vector<8x8xbf16>
    %c0_7 = arith.constant 0 : index
    %c0_8 = arith.constant 0 : index
    %c0_9 = arith.constant 0 : index
    %c0_10 = arith.constant 0 : index
    %4 = vector.load %arg5[%c0_7, %c0_8, %c0_9, %c0_10] : memref<1x1x8x8xbf16, #tpu.memory_space<vmem>>, vector<1x1x8x8xbf16>
    %5 = vector.shape_cast %4 : vector<1x1x8x8xbf16> to vector<8x8xbf16>
    %cst = arith.constant dense<0.000000e+00> : vector<8x8xf32>
    %6 = tpu.matmul %1, %3, %cst {dimension_numbers = #tpu.dot_dimension_numbers<[1], [1], [0], [0], [0, 0, 1, 0], [], []>} : vector<8x8xbf16>, vector<8x8xbf16>, vector<8x8xf32> -> vector<8x8xf32>
    %cst_11 = arith.constant 0.353553385 : f32
    %7 = vector.broadcast %cst_11 : f32 to vector<8x8xf32>
    %8 = arith.mulf %6, %7 : vector<8x8xf32>
    %9 = arith.index_cast %arg0 : i32 to index
    %c0_12 = arith.constant 0 : index
    %10 = vector.load %arg2[%9, %c0_12] : memref<2x8xf32, #tpu.memory_space<vmem>>, vector<1x8xf32>
    %cst_13 = arith.constant 5.000000e-01 : f32
    %11 = vector.broadcast %cst_13 : f32 to vector<1x8xf32>
    %12 = arith.cmpf ogt, %10, %11 : vector<1x8xf32>
    %13 = tpu.iota {dimensions = array<i32: 0>} : vector<8x8xi32>
    %14 = tpu.iota {dimensions = array<i32: 1>} : vector<8x8xi32>
    %15 = arith.cmpi sge, %13, %14 : vector<8x8xi32>
    %16 = vector.broadcast %12 : vector<1x8xi1> to vector<8x8xi1>
    %17 = arith.andi %16, %15 : vector<8x8xi1>
    %cst_14 = arith.constant -1.000000e+09 : f32
    %18 = vector.broadcast %cst_14 : f32 to vector<8x8xf32>
    %19 = arith.select %17, %8, %18 : vector<8x8xi1>, vector<8x8xf32>
    %cst_15 = arith.constant dense<0xFF800000> : vector<8xf32>
    %20 = vector.multi_reduction <maximumf>, %19, %cst_15 [1] : vector<8x8xf32> to vector<8xf32>
    %21 = vector.shape_cast %20 : vector<8xf32> to vector<8x1xf32>
    %22 = vector.broadcast %21 : vector<8x1xf32> to vector<8x8xf32>
    %23 = arith.subf %19, %22 : vector<8x8xf32>
    %24 = math.exp %23 : vector<8x8xf32>
    %cst_16 = arith.constant dense<0.000000e+00> : vector<8xf32>
    %25 = vector.multi_reduction <add>, %24, %cst_16 [1] : vector<8x8xf32> to vector<8xf32>
    %26 = vector.shape_cast %25 : vector<8xf32> to vector<8x1xf32>
    %27 = vector.broadcast %26 : vector<8x1xf32> to vector<8x8xf32>
    %28 = arith.divf %24, %27 : vector<8x8xf32>
    %29 = arith.truncf %28 : vector<8x8xf32> to vector<8x8xbf16>
    %cst_17 = arith.constant dense<0.000000e+00> : vector<8x8xf32>
    %30 = tpu.matmul %29, %5, %cst_17 {dimension_numbers = #tpu.dot_dimension_numbers<[1], [0], [0], [1], [0, 0, 1, 1], [], []>} : vector<8x8xbf16>, vector<8x8xbf16>, vector<8x8xf32> -> vector<8x8xf32>
    %31 = vector.shape_cast %30 : vector<8x8xf32> to vector<1x1x8x8xf32>
    %32 = arith.truncf %31 : vector<1x1x8x8xf32> to vector<1x1x8x8xbf16>
    %c0_18 = arith.constant 0 : index
    %c0_19 = arith.constant 0 : index
    %c0_20 = arith.constant 0 : index
    %c0_21 = arith.constant 0 : index
    %33 = vector.load %arg6[%c0_18, %c0_19, %c0_20, %c0_21] : memref<1x1x8x8xbf16, #tpu.memory_space<vmem>>, vector<1x1x8x8xbf16>
    tpu.vector_store %arg6[%c0_18, %c0_19, %c0_20, %c0_21], %32 {strides = array<i32>} : memref<1x1x8x8xbf16, #tpu.memory_space<vmem>>, vector<1x1x8x8xbf16>,
    %34 = vector.shape_cast %28 : vector<8x8xf32> to vector<1x1x8x8xf32>
    %c0_22 = arith.constant 0 : index
    %c0_23 = arith.constant 0 : index
    %c0_24 = arith.constant 0 : index
    %c0_25 = arith.constant 0 : index
    %35 = vector.load %arg7[%c0_22, %c0_23, %c0_24, %c0_25] : memref<1x1x8x8xf32, #tpu.memory_space<vmem>>, vector<1x1x8x8xf32>
    tpu.vector_store %arg7[%c0_22, %c0_23, %c0_24, %c0_25], %34 {strides = array<i32>} : memref<1x1x8x8xf32, #tpu.memory_space<vmem>>, vector<1x1x8x8xf32>,
    return
  }
  func.func @transform_0(%arg0: i32, %arg1: i32) -> (i32, i32) {
    %c0_i32 = arith.constant 0 : i32
    %c0_i32_0 = arith.constant 0 : i32
    %c0_i32_1 = arith.constant 0 : i32
    return %c0_i32, %c0_i32_0 : i32, i32
  }
  func.func @transform_1(%arg0: i32, %arg1: i32) -> (i32, i32, i32, i32) {
    %c0_i32 = arith.constant 0 : i32
    %c0_i32_0 = arith.constant 0 : i32
    %c0_i32_1 = arith.constant 0 : i32
    return %arg0, %arg1, %c0_i32, %c0_i32_0 : i32, i32, i32, i32
  }
  func.func @transform_2(%arg0: i32, %arg1: i32) -> (i32, i32, i32, i32) {
    %c0_i32 = arith.constant 0 : i32
    %c0_i32_0 = arith.constant 0 : i32
    %c0_i32_1 = arith.constant 0 : i32
    return %arg0, %arg1, %c0_i32, %c0_i32_0 : i32, i32, i32, i32
  }
  func.func @transform_3(%arg0: i32, %arg1: i32) -> (i32, i32, i32, i32) {
    %c0_i32 = arith.constant 0 : i32
    %c0_i32_0 = arith.constant 0 : i32
    %c0_i32_1 = arith.constant 0 : i32
    return %arg0, %arg1, %c0_i32, %c0_i32_0 : i32, i32, i32, i32
  }
  func.func @transform_4(%arg0: i32, %arg1: i32) -> (i32, i32, i32, i32) {
    %c0_i32 = arith.constant 0 : i32
    %c0_i32_0 = arith.constant 0 : i32
    %c0_i32_1 = arith.constant 0 : i32
    return %arg0, %arg1, %c0_i32, %c0_i32_0 : i32, i32, i32, i32
  }
  func.func @transform_5(%arg0: i32, %arg1: i32) -> (i32, i32, i32, i32) {
    %c0_i32 = arith.constant 0 : i32
    %c0_i32_0 = arith.constant 0 : i32
    %c0_i32_1 = arith.constant 0 : i32
    return %arg0, %arg1, %c0_i32, %c0_i32_0 : i32, i32, i32, i32
  }
}

module attributes {stable_mosaic.version = 11 : i64} {
  func.func @_split_proj_kernel(%arg0: i32, %arg1: memref<16x32xbf16, #tpu.memory_space<vmem>>, %arg2: memref<32x32xbf16, #tpu.memory_space<vmem>>, %arg3: memref<1x32xf32, #tpu.memory_space<vmem>>, %arg4: memref<16x32xbf16, #tpu.memory_space<vmem>>) attributes {dimension_semantics = [#tpu.dimension_semantics<parallel>], iteration_bounds = array<i64: 1>, scalar_prefetch = 0 : i64, scratch_operands = 0 : i64, tpu.core_type = #tpu.core_type<tc>, window_params = [{transform_indices = @transform_0, window_bounds = array<i64: 16, 32>}, {pipeline_mode = #tpu.pipeline_mode<synchronous>, transform_indices = @transform_1, window_bounds = array<i64: 32, 32>}, {pipeline_mode = #tpu.pipeline_mode<synchronous>, transform_indices = @transform_2, window_bounds = array<i64: 1, 32>}, {transform_indices = @transform_3, window_bounds = array<i64: 16, 32>}]} {
    %c0 = arith.constant 0 : index
    %c0_0 = arith.constant 0 : index
    %0 = vector.load %arg1[%c0, %c0_0] : memref<16x32xbf16, #tpu.memory_space<vmem>>, vector<16x32xbf16>
    %c0_1 = arith.constant 0 : index
    %c0_2 = arith.constant 0 : index
    %1 = vector.load %arg2[%c0_1, %c0_2] : memref<32x32xbf16, #tpu.memory_space<vmem>>, vector<32x32xbf16>
    %cst = arith.constant dense<0.000000e+00> : vector<16x32xf32>
    %2 = tpu.matmul %0, %1, %cst {dimension_numbers = #tpu.dot_dimension_numbers<[1], [0], [0], [1], [0, 0, 1, 1], [], []>} : vector<16x32xbf16>, vector<32x32xbf16>, vector<16x32xf32> -> vector<16x32xf32>
    %c0_3 = arith.constant 0 : index
    %c0_4 = arith.constant 0 : index
    %3 = vector.load %arg3[%c0_3, %c0_4] : memref<1x32xf32, #tpu.memory_space<vmem>>, vector<1x32xf32>
    %4 = vector.broadcast %3 : vector<1x32xf32> to vector<16x32xf32>
    %5 = arith.addf %2, %4 : vector<16x32xf32>
    %6 = arith.truncf %5 : vector<16x32xf32> to vector<16x32xbf16>
    %c0_5 = arith.constant 0 : index
    %c0_6 = arith.constant 0 : index
    %7 = vector.load %arg4[%c0_5, %c0_6] : memref<16x32xbf16, #tpu.memory_space<vmem>>, vector<16x32xbf16>
    tpu.vector_store %arg4[%c0_5, %c0_6], %6 {strides = array<i32>} : memref<16x32xbf16, #tpu.memory_space<vmem>>, vector<16x32xbf16>,
    return
  }
  func.func @transform_0(%arg0: i32) -> (i32, i32) {
    %c0_i32 = arith.constant 0 : i32
    %c0_i32_0 = arith.constant 0 : i32
    return %arg0, %c0_i32 : i32, i32
  }
  func.func @transform_1(%arg0: i32) -> (i32, i32) {
    %c0_i32 = arith.constant 0 : i32
    %c0_i32_0 = arith.constant 0 : i32
    %c0_i32_1 = arith.constant 0 : i32
    return %c0_i32, %c0_i32_0 : i32, i32
  }
  func.func @transform_2(%arg0: i32) -> (i32, i32) {
    %c0_i32 = arith.constant 0 : i32
    %c0_i32_0 = arith.constant 0 : i32
    %c0_i32_1 = arith.constant 0 : i32
    return %c0_i32, %c0_i32_0 : i32, i32
  }
  func.func @transform_3(%arg0: i32) -> (i32, i32) {
    %c0_i32 = arith.constant 0 : i32
    %c0_i32_0 = arith.constant 0 : i32
    return %arg0, %c0_i32 : i32, i32
  }
}

module attributes {stable_mosaic.version = 11 : i64} {
  func.func @_attn_kernel(%arg0: i32, %arg1: i32, %arg2: memref<2x8xf32, #tpu.memory_space<vmem>>, %arg3: memref<1x1x8x8xbf16, #tpu.memory_space<vmem>>, %arg4: memref<1x1x8x8xbf16, #tpu.memory_space<vmem>>, %arg5: memref<1x1x8x8xbf16, #tpu.memory_space<vmem>>, %arg6: memref<1x1x8x8xbf16, #tpu.memory_space<vmem>>, %arg7: memref<1x1x8x8xf32, #tpu.memory_space<vmem>>) attributes {dimension_semantics = [#tpu.dimension_semantics<parallel>, #tpu.dimension_semantics<parallel>], iteration_bounds = array<i64: 2, 4>, scalar_prefetch = 0 : i64, scratch_operands = 0 : i64, tpu.core_type = #tpu.core_type<tc>, window_params = [{pipeline_mode = #tpu.pipeline_mode<synchronous>, transform_indices = @transform_0, window_bounds = array<i64: 2, 8>}, {transform_indices = @transform_1, window_bounds = array<i64: 1, 1, 8, 8>}, {transform_indices = @transform_2, window_bounds = array<i64: 1, 1, 8, 8>}, {transform_indices = @transform_3, window_bounds = array<i64: 1, 1, 8, 8>}, {transform_indices = @transform_4, window_bounds = array<i64: 1, 1, 8, 8>}, {transform_indices = @transform_5, window_bounds = array<i64: 1, 1, 8, 8>}]} {
    %c0 = arith.constant 0 : index
    %c0_0 = arith.constant 0 : index
    %c0_1 = arith.constant 0 : index
    %c0_2 = arith.constant 0 : index
    %0 = vector.load %arg3[%c0, %c0_0, %c0_1, %c0_2] : memref<1x1x8x8xbf16, #tpu.memory_space<vmem>>, vector<1x1x8x8xbf16>
    %1 = vector.shape_cast %0 : vector<1x1x8x8xbf16> to vector<8x8xbf16>
    %c0_3 = arith.constant 0 : index
    %c0_4 = arith.constant 0 : index
    %c0_5 = arith.constant 0 : index
    %c0_6 = arith.constant 0 : index
    %2 = vector.load %arg4[%c0_3, %c0_4, %c0_5, %c0_6] : memref<1x1x8x8xbf16, #tpu.memory_space<vmem>>, vector<1x1x8x8xbf16>
    %3 = vector.shape_cast %2 : vector<1x1x8x8xbf16> to vector<8x8xbf16>
    %c0_7 = arith.constant 0 : index
    %c0_8 = arith.constant 0 : index
    %c0_9 = arith.constant 0 : index
    %c0_10 = arith.constant 0 : index
    %4 = vector.load %arg5[%c0_7, %c0_8, %c0_9, %c0_10] : memref<1x1x8x8xbf16, #tpu.memory_space<vmem>>, vector<1x1x8x8xbf16>
    %5 = vector.shape_cast %4 : vector<1x1x8x8xbf16> to vector<8x8xbf16>
    %cst = arith.constant dense<0.000000e+00> : vector<8x8xf32>
    %6 = tpu.matmul %1, %3, %cst {dimension_numbers = #tpu.dot_dimension_numbers<[1], [1], [0], [0], [0, 0, 1, 0], [], []>} : vector<8x8xbf16>, vector<8x8xbf16>, vector<8x8xf32> -> vector<8x8xf32>
    %cst_11 = arith.constant 0.353553385 : f32
    %7 = vector.broadcast %cst_11 : f32 to vector<8x8xf32>
    %8 = arith.mulf %6, %7 : vector<8x8xf32>
    %9 = arith.index_cast %arg0 : i32 to index
    %c0_12 = arith.constant 0 : index
    %10 = vector.load %arg2[%9, %c0_12] : memref<2x8xf32, #tpu.memory_space<vmem>>, vector<1x8xf32>
    %cst_13 = arith.constant 5.000000e-01 : f32
    %11 = vector.broadcast %cst_13 : f32 to vector<1x8xf32>
    %12 = arith.cmpf ogt, %10, %11 : vector<1x8xf32>
    %cst_14 = arith.constant -1.000000e+09 : f32
    %13 = vector.shape_cast %12 : vector<1x8xi1> to vector<1x8xi1>
    %14 = vector.broadcast %13 : vector<1x8xi1> to vector<8x8xi1>
    %15 = vector.broadcast %cst_14 : f32 to vector<8x8xf32>
    %16 = arith.select %14, %8, %15 : vector<8x8xi1>, vector<8x8xf32>
    %cst_15 = arith.constant dense<0xFF800000> : vector<8xf32>
    %17 = vector.multi_reduction <maximumf>, %16, %cst_15 [1] : vector<8x8xf32> to vector<8xf32>
    %18 = vector.shape_cast %17 : vector<8xf32> to vector<8x1xf32>
    %19 = vector.broadcast %18 : vector<8x1xf32> to vector<8x8xf32>
    %20 = arith.subf %16, %19 : vector<8x8xf32>
    %21 = math.exp %20 : vector<8x8xf32>
    %cst_16 = arith.constant dense<0.000000e+00> : vector<8xf32>
    %22 = vector.multi_reduction <add>, %21, %cst_16 [1] : vector<8x8xf32> to vector<8xf32>
    %23 = vector.shape_cast %22 : vector<8xf32> to vector<8x1xf32>
    %24 = vector.broadcast %23 : vector<8x1xf32> to vector<8x8xf32>
    %25 = arith.divf %21, %24 : vector<8x8xf32>
    %26 = arith.truncf %25 : vector<8x8xf32> to vector<8x8xbf16>
    %cst_17 = arith.constant dense<0.000000e+00> : vector<8x8xf32>
    %27 = tpu.matmul %26, %5, %cst_17 {dimension_numbers = #tpu.dot_dimension_numbers<[1], [0], [0], [1], [0, 0, 1, 1], [], []>} : vector<8x8xbf16>, vector<8x8xbf16>, vector<8x8xf32> -> vector<8x8xf32>
    %28 = vector.shape_cast %27 : vector<8x8xf32> to vector<1x1x8x8xf32>
    %29 = arith.truncf %28 : vector<1x1x8x8xf32> to vector<1x1x8x8xbf16>
    %c0_18 = arith.constant 0 : index
    %c0_19 = arith.constant 0 : index
    %c0_20 = arith.constant 0 : index
    %c0_21 = arith.constant 0 : index
    %30 = vector.load %arg6[%c0_18, %c0_19, %c0_20, %c0_21] : memref<1x1x8x8xbf16, #tpu.memory_space<vmem>>, vector<1x1x8x8xbf16>
    tpu.vector_store %arg6[%c0_18, %c0_19, %c0_20, %c0_21], %29 {strides = array<i32>} : memref<1x1x8x8xbf16, #tpu.memory_space<vmem>>, vector<1x1x8x8xbf16>,
    %31 = vector.shape_cast %25 : vector<8x8xf32> to vector<1x1x8x8xf32>
    %c0_22 = arith.constant 0 : index
    %c0_23 = arith.constant 0 : index
    %c0_24 = arith.constant 0 : index
    %c0_25 = arith.constant 0 : index
    %32 = vector.load %arg7[%c0_22, %c0_23, %c0_24, %c0_25] : memref<1x1x8x8xf32, #tpu.memory_space<vmem>>, vector<1x1x8x8xf32>
    tpu.vector_store %arg7[%c0_22, %c0_23, %c0_24, %c0_25], %31 {strides = array<i32>} : memref<1x1x8x8xf32, #tpu.memory_space<vmem>>, vector<1x1x8x8xf32>,
    return
  }
  func.func @transform_0(%arg0: i32, %arg1: i32) -> (i32, i32) {
    %c0_i32 = arith.constant 0 : i32
    %c0_i32_0 = arith.constant 0 : i32
    %c0_i32_1 = arith.constant 0 : i32
    return %c0_i32, %c0_i32_0 : i32, i32
  }
  func.func @transform_1(%arg0: i32, %arg1: i32) -> (i32, i32, i32, i32) {
    %c0_i32 = arith.constant 0 : i32
    %c0_i32_0 = arith.constant 0 : i32
    %c0_i32_1 = arith.constant 0 : i32
    return %arg0, %arg1, %c0_i32, %c0_i32_0 : i32, i32, i32, i32
  }
  func.func @transform_2(%arg0: i32, %arg1: i32) -> (i32, i32, i32, i32) {
    %c0_i32 = arith.constant 0 : i32
    %c0_i32_0 = arith.constant 0 : i32
    %c0_i32_1 = arith.constant 0 : i32
    return %arg0, %arg1, %c0_i32, %c0_i32_0 : i32, i32, i32, i32
  }
  func.func @transform_3(%arg0: i32, %arg1: i32) -> (i32, i32, i32, i32) {
    %c0_i32 = arith.constant 0 : i32
    %c0_i32_0 = arith.constant 0 : i32
    %c0_i32_1 = arith.constant 0 : i32
    return %arg0, %arg1, %c0_i32, %c0_i32_0 : i32, i32, i32, i32
  }
  func.func @transform_4(%arg0: i32, %arg1: i32) -> (i32, i32, i32, i32) {
    %c0_i32 = arith.constant 0 : i32
    %c0_i32_0 = arith.constant 0 : i32
    %c0_i32_1 = arith.constant 0 : i32
    return %arg0, %arg1, %c0_i32, %c0_i32_0 : i32, i32, i32, i32
  }
  func.func @transform_5(%arg0: i32, %arg1: i32) -> (i32, i32, i32, i32) {
    %c0_i32 = arith.constant 0 : i32
    %c0_i32_0 = arith.constant 0 : i32
    %c0_i32_1 = arith.constant 0 : i32
    return %arg0, %arg1, %c0_i32, %c0_i32_0 : i32, i32, i32, i32
  }
}

</mosaic_0001>

<bundles_post_ra>
// kernel: _lambda_.24
= control target key start
LH: loop header
LB: loop body
LE: loop exit
PB: predicated region body
PF: predicated region fallthrough
CT: control target
= control target key end

     0   :  { %v159_v0 = vmov 0.0   ;;  %vm160_vm0 = vmmov 0   ;;  %vm48_vm1 = vcmask 261120   ;;  %vm101_vm2 = vcmask 257024   ;;  %s162_s27 = smov 96   ;;  %s229_s1 = inlined_call_operand.vmem [shape: bf16[32,96], index: 1, kind: input, shape index: {}]   ;;  %s230_s0 = inlined_call_operand.vmem [shape: bf16[16,32], index: 0, kind: input, shape index: {}]   ;;  %s231_s2 = inlined_call_operand.vmem [shape: f32[1,96], index: 2, kind: input, shape index: {}]   ;;  %s232_s3 = inlined_call_operand.vmem [shape: bf16[16,32], index: 3, kind: output, shape index: {0}]   ;;  %s233_s5 = inlined_call_operand.vmem [shape: bf16[16,32], index: 5, kind: output, shape index: {2}]   ;;  %s234_s4 = inlined_call_operand.vmem [shape: bf16[16,32], index: 4, kind: output, shape index: {1}]  }
   0x1   :  { %144 = vmatprep.subr.bf16.mxu0 %v159_v0  ;;  %v156_v1 = vld [vmem:[%s229_s1 + $0x8] sm:$0xff]   ;;  %148 = vmatprep.mubr.msk.bf16.mxu0 %vm160_vm0, %v159_v0  ;;  %v157_v2 = vld [vmem:[%s229_s1] sm:$0xff]  }
   0x2   :  { %145 = vmatpush3.bf16.msra.mxu0 %v156_v1  ;;  %v158_v3 = vld [vmem:[%s230_s0] sm:$0xff]   ;;  %s161_s0 = smov 64  }
   0x3   :  { %146 = vmatprep.subr.bf16.mxu0 %v159_v0  ;;  %v132_v4 = vld [vmem:[%s231_s2] ss:$0 sm:$0xff] }
   0x6   :  { %147 = vmatpush3.bf16.msra.mxu0 %v157_v2 }
   0x9   :  { %149 = vmatmul.mubr.msk.bf16.vlgmr.msra.gmra.mxu0 %vm48_vm1, %v158_v3 }
  0xc9   :  { %v86_v5 = vpop.f32.mrf.mxu0 }
  0xca   :  { %v87_v6 = vadd.f32 %v132_v4, %v86_v5 }
  0xcb   :  { %v150_v7 = vpop.f32.mrf.mxu0 }
  0xcc   :  { %v139_v8 = vpack.c.bf16 %v87_v6, %v87_v6 }
  0xcd   :  { %v89_v9 = vpop.f32.mrf.mxu0 }
  0xce   :  { %102 = vst.msk [vmem:[%s232_s3] sm:$0xf] %vm101_vm2, %v139_v8  ;;  %v90_v10 = vadd.f32 %v132_v4, %v89_v9  ;;  %112 = vrot.lane.b32.xlu1 %v139_v8, %s161_s0  ;;  %104 = vrot.lane.b32.xlu0 %v139_v8, %s162_s27 }
  0xcf   :  { %v151_v11 = vpop.f32.mrf.mxu0 }
  0xd0   :  { %v140_v12 = vpack.c.bf16 %v90_v10, %v90_v10 }
  0xd2   :  { %103 = vst.msk [vmem:[%s232_s3 + $0x4] sm:$0xf] %vm101_vm2, %v140_v12  ;;  %114 = vrot.lane.b32.xlu1 %v140_v12, %s161_s0  ;;  %106 = vrot.lane.b32.xlu0 %v140_v12, %s162_s27 }
 0x140   :  { %v113_v13 = vpop.permute.xlu1 %112  ;;  %v105_v14 = vpop.permute.xlu0 %104 }
 0x141   :  { %118 = vst.msk [vmem:[%s233_s5] sm:$0xf] %vm101_vm2, %v113_v13  ;;  %110 = vst.msk [vmem:[%s234_s4] sm:$0xf] %vm101_vm2, %v105_v14 }
 0x144   :  { %v115_v15 = vpop.permute.xlu1 %114  ;;  %v107_v16 = vpop.permute.xlu0 %106 }
 0x145   :  { %119 = vst.msk [vmem:[%s233_s5 + $0x4] sm:$0xf] %vm101_vm2, %v115_v15  ;;  %111 = vst.msk [vmem:[%s234_s4 + $0x4] sm:$0xf] %vm101_vm2, %v107_v16 }

// kernel: _lambda_.25
= control target key start
LH: loop header
LB: loop body
LE: loop exit
PB: predicated region body
PF: predicated region fallthrough
CT: control target
= control target key end

     0   :  { %s686_s15 = smov 0   ;;  %s688_s16 = smov 0   ;;  %s762_s0 = inlined_call_operand.vmem [shape: f32[2,8], index: 0, kind: input, shape index: {}]   ;;  %s763_s1 = inlined_call_operand.vmem [shape: bf16[2,4,8,8], index: 1, kind: input, shape index: {}]   ;;  %s764_s2 = inlined_call_operand.vmem [shape: bf16[2,4,8,8], index: 2, kind: input, shape index: {}]   ;;  %s765_s3 = inlined_call_operand.vmem [shape: bf16[2,4,8,8], index: 3, kind: input, shape index: {}]   ;;  %s766_s4 = inlined_call_operand.vmem [shape: bf16[2,4,8,8], index: 4, kind: output, shape index: {}]  }
   0x1   :  { %s690_s17 = smov 0   ;;  %s692_s18 = smov 0  }
   0x2   :  { %s694_s19 = smov 0  }
   0x3 LB: > { %s23_s20 = sadd.s32 1, %s648_s17  ;;  %s26_s21 = sadd.s32 1, %s652_s18  ;;  %s656_s19 = sphi %s694_s19, %s14_s19   ;;  %s652_s18 = sphi %s692_s18, %s770_s18   ;;  %s648_s17 = sphi %s690_s17, %s769_s17   ;;  %s644_s16 = sphi %s688_s16, %s768_s16   ;;  %s640_s15 = sphi %s686_s15, %s767_s15  }
   0x4   : > { %p24_p0 = scmp.ge.s32.totalorder %s23_s20, 4  ;;  %p542_p1 = scmp.ge.s32.totalorder %s656_s19, 1 }
   0x5   : > { %p211_p2 = scmp.lt.s32.totalorder %s656_s19, 9 }
   0x6   : > { %s772_s20 = smov (%p24_p0, %s23_s20), 0  ;;  %s774_s21 = smov (!%p24_p0, %s26_s21), %s652_s18 }
   0x7   : > { %p212_p3 = pnand %p542_p1, %p211_p2  ;;  %p28_p4 = scmp.ge.s32.totalorder %s774_s21, 2 }
   0x8   : > { %p259_p5 = scmp.lt.s32.totalorder (!%p212_p3), %s644_s16, 1  ;;  %p261_p6 = scmp.lt.s32.totalorder (!%p212_p3), %s640_s15, 3 }
   0x9   : > { %s776_s21 = smov (%p28_p4, %s774_s21), 0  ;;  %215 = sbr.rel (%p212_p3) target bundleno = 738 (0x2e2), region = 36 }
   0xa   : > { %s343_s8 = scalar_lea.vmem (!%p212_p3), %s762_s0, %s644_s16 }
   0xe   : > { %v658_v0 = vmov 0.0   ;;  %vm659_vm0 = vmmov 0   ;;  %s260_s22 = scalar_select %p259_p5, %s644_s16, 1  ;;  %vm295_vm1 = vcmask 64512   ;;  %v347_v4 = vlaneseq  ;;  %v344_v5 = vld [vmem:[%s343_s8] sm:$0x1] }
   0xf   : > { %559 = vmatprep.subr.bf16.mxu0 %v658_v0  ;;  %561 = vmatprep.mubr.msk.bf16.mxu0 %vm659_vm0, %v658_v0  ;;  %s778_s15 = smov (!%p261_p6, %s640_s15), 3  ;;  %vm345_vm2 = vcmp.gt.f32.partialorder %v344_v5, 0.5  ;;  %v660_v8 = vmov 0   ;;  %vm368_vm4 = vcmask 1043456   ;;  %vm413_vm5 = vcmask 60416  }
  0x10   : > { %565 = vmatprep.subr.bf16.mxu1 %v658_v0  ;;  %567 = vmatprep.mubr.msk.bf16.mxu1 %vm659_vm0, %v658_v0  ;;  %s543_s23 = sshll.u32 %s260_s22, 2  ;;  %v348_v6 = vshrl.u32 %v347_v4, 7  ;;  %v346_v9 = vsel %vm345_vm2, 1, %v660_v8 }
  0x11   : > { %s264_s24 = sadd.s32 %s543_s23, %s778_s15 }
  0x12   : > { %s720_s25 = sshll.u32 %s264_s24, 2  ;;  %v349_v7 = vsub.s32 0, %v348_v6 }
  0x13   : > { %s274_s28 = scalar_lea.vmem %s764_s2, %s720_s25  ;;  %s266_s5 = scalar_lea.vmem %s763_s1, %s720_s25 }
  0x14   : > { %v293_v1 = vld [vmem:[%s274_s28] sm:$0xf]  ;;  %v350_v10 = vrot.slane %v346_v9, %v349_v7  ;;  %s282_s11 = scalar_lea.vmem %s765_s3, %s720_s25  ;;  %s290_s14 = scalar_lea.vmem %s766_s4, %s720_s25 }
  0x15   : > { %v300_v2 = vsel %vm295_vm1, %v293_v1, 0  ;;  %v292_v3 = vld [vmem:[%s266_s5] sm:$0xf] }
  0x16   : > { %560 = vmatpush3.bf16.xpose.msra.mxu0 %v300_v2  ;;  %vm351_vm3 = vcmp.eq.s32.totalorder %v350_v10, 1  ;;  %v294_v23 = vld [vmem:[%s282_s11] sm:$0xf] }
  0x17   : > { %v370_v24 = vsel %vm368_vm4, %v294_v23, 0 }
  0x18   : > { %566 = vmatpush3.bf16.msra.mxu1 %v370_v24 }
  0x1d   : > { %562 = vmatmul.mubr.msk.bf16.vlgmr.msra.gmra.mxu0 %vm295_vm1, %v292_v3 }
  0xdd   : > { %v336_v11 = vpop.f32.mrf.mxu0 }
  0xde   : > { %v342_v12 = vmul.f32 0.35355338, %v336_v11 }
  0xdf   : > { %v563_v13 = vpop.f32.mrf.mxu0 }
  0xe0   : > { %v352_v14 = vsel %vm351_vm3, %v342_v12, -1e+09 }
  0xe1   : > { %v339_v15 = vpop.f32.mrf.mxu0  ;;  %v353_v16 = vsel %vm295_vm1, %v352_v14, -inf }
  0xe2   : > { %354 = vmax.xlane.f32.xlu0 %v353_v16 }
  0xe3   : > { %v564_v17 = vpop.f32.mrf.mxu0 }
 0x16b   : > { %v355_v18 = vpop.xlane.xlu0 %354 }
 0x16c   : > { %v356_v19 = vsub.f32 %v352_v14, %v355_v18 }
 0x16e   : > { %v357_v20 = vmul.f32 1.442695, %v356_v19 }
 0x170   : > { %614 = vpow2.f32 %v357_v20 }
 0x17d   : > { %v615_v21 = vpop.eup %614 }
 0x17e   : > { %v359_v22 = vsel %vm295_vm1, %v615_v21, 0.0 }
 0x17f   : > { %360 = vadd.xlane.f32.xlu0 %v359_v22 }
 0x208   : > { %v361_v25 = vpop.xlane.xlu0 %360 }
 0x209   : > { %616 = vrcp.f32 %v361_v25 }
 0x216   : > { %v617_v26 = vpop.eup %616 }
 0x217   : > { %v363_v27 = vmul.f32 %v617_v26, %v615_v21 }
 0x219   : > { %v364_v28 = vpack.c.bf16 %v363_v27, %v363_v27 }
 0x21b   : > { %568 = vmatmul.mubr.msk.bf16.vlgmr.msra.gmra.mxu1 %vm295_vm1, %v364_v28 }
 0x2db   : > { %v406_v29 = vpop.f32.mrf.mxu1 }
 0x2dc   : > { %v412_v30 = vpack.c.bf16 %v406_v29, %v406_v29 }
 0x2dd   : > { %v569_v31 = vpop.f32.mrf.mxu1 }
 0x2de   : > { %414 = vst.msk [vmem:[%s290_s14] sm:$0xf] %vm413_vm5, %v412_v30 }
 0x2df   : > { %v409_v32 = vpop.f32.mrf.mxu1 }
 0x2e1   : > { %v570_v33 = vpop.f32.mrf.mxu1 }
 0x2e2 PF: > { %s14_s19 = sadd.s32 1, %s656_s19   ;;  %s767_s15 = smov %s648_s17 }
 0x2e3   : > { %p11_p7 = scmp.ge.s32.totalorder %s14_s19, 10   ;;  %s768_s16 = smov %s652_s18 }
 0x2e4   : > { %s769_s17 = smov %s772_s20  ;;  %s770_s18 = smov %s776_s21 }
 0x2e5   :  { %13 = sbr.rel (!%p11_p7) target bundleno = 3 (0x3), region = 73 }

// kernel: _lambda_.26
= control target key start
LH: loop header
LB: loop body
LE: loop exit
PB: predicated region body
PF: predicated region fallthrough
CT: control target
= control target key end

     0   :  { %v200_v0 = vmov 0.0   ;;  %vm201_vm0 = vmmov 0   ;;  %vm54_vm1 = vcmask 261120   ;;  %vm158_vm2 = vcmask 257024   ;;  %s269_s1 = inlined_call_operand.vmem [shape: bf16[32,32], index: 1, kind: input, shape index: {}]   ;;  %s270_s0 = inlined_call_operand.vmem [shape: bf16[16,32], index: 0, kind: input, shape index: {}]   ;;  %s271_s3 = inlined_call_operand.vmem [shape: bf16[16,32], index: 3, kind: input, shape index: {}]   ;;  %s272_s2 = inlined_call_operand.vmem [shape: f32[1,32], index: 2, kind: input, shape index: {}]   ;;  %s273_s4 = inlined_call_operand.vmem [shape: f32[1,32], index: 4, kind: input, shape index: {}]   ;;  %s274_s5 = inlined_call_operand.vmem [shape: f32[1,32], index: 5, kind: input, shape index: {}]   ;;  %s275_s6 = inlined_call_operand.vmem [shape: bf16[16,32], index: 6, kind: output, shape index: {}]  }
   0x1   :  { %183 = vmatprep.subr.bf16.mxu0 %v200_v0  ;;  %v193_v1 = vld [vmem:[%s269_s1 + $0x8] sm:$0xff]   ;;  %187 = vmatprep.mubr.msk.bf16.mxu0 %vm201_vm0, %v200_v0  ;;  %v194_v2 = vld [vmem:[%s269_s1] sm:$0xff]  }
   0x2   :  { %184 = vmatpush3.bf16.msra.mxu0 %v193_v1  ;;  %v195_v3 = vld [vmem:[%s270_s0] sm:$0xff]  }
   0x3   :  { %185 = vmatprep.subr.bf16.mxu0 %v200_v0  ;;  %v177_v4 = vld [vmem:[%s271_s3] sm:$0xff]  }
   0x4   :  { %v165_v5 = vld [vmem:[%s272_s2] ss:$0 sm:$0xff]  ;;  %v178_v6 = vunpack.c.l.bf16 %v177_v4  ;;  %v179_v11 = vunpack.c.h.bf16 %v177_v4 }
   0x5   :  { %v170_v35 = vld [vmem:[%s273_s4] ss:$0 sm:$0xff] }
   0x6   :  { %186 = vmatpush3.bf16.msra.mxu0 %v194_v2  ;;  %v171_v37 = vld [vmem:[%s274_s5] ss:$0 sm:$0xff] }
   0x9   :  { %188 = vmatmul.mubr.msk.bf16.vlgmr.msra.gmra.mxu0 %vm54_vm1, %v195_v3 }
  0xc9   :  { %v92_v7 = vpop.f32.mrf.mxu0 }
  0xca   :  { %v93_v8 = vadd.f32 %v165_v5, %v92_v7 }
  0xcb   :  { %v189_v9 = vpop.f32.mrf.mxu0 }
  0xcc   :  { %v103_v10 = vadd.f32 %v178_v6, %v93_v8 }
  0xcd   :  { %v95_v12 = vpop.f32.mrf.mxu0 }
  0xce   :  { %v96_v13 = vadd.f32 %v165_v5, %v95_v12  ;;  %v107_v14 = vsel %vm54_vm1, %v103_v10, 0.0 }
  0xcf   :  { %108 = vadd.xlane.f32.xlu0 %v107_v14  ;;  %v190_v15 = vpop.f32.mrf.mxu0 }
  0xd0   :  { %v104_v16 = vadd.f32 %v179_v11, %v96_v13 }
  0xd2   :  { %v110_v17 = vsel %vm54_vm1, %v104_v16, 0.0 }
  0xd3   :  { %111 = vadd.xlane.f32.xlu0 %v110_v17 }
 0x158   :  { %v109_v18 = vpop.xlane.xlu0 %108 }
 0x159   :  { %v114_v19 = vmul.f32 0.03125, %v109_v18 }
 0x15b   :  { %v116_v20 = vsub.f32 %v103_v10, %v114_v19 }
 0x15c   :  { %v112_v21 = vpop.xlane.xlu0 %111 }
 0x15d   :  { %v115_v22 = vmul.f32 0.03125, %v112_v21  ;;  %v118_v23 = vmul.f32 %v116_v20, %v116_v20 }
 0x15f   :  { %v117_v24 = vsub.f32 %v104_v16, %v115_v22  ;;  %v120_v25 = vsel %vm54_vm1, %v118_v23, 0.0 }
 0x160   :  { %121 = vadd.xlane.f32.xlu1 %v120_v25 }
 0x161   :  { %v119_v26 = vmul.f32 %v117_v24, %v117_v24 }
 0x163   :  { %v123_v27 = vsel %vm54_vm1, %v119_v26, 0.0 }
 0x164   :  { %124 = vadd.xlane.f32.xlu1 %v123_v27 }
 0x1e9   :  { %v122_v28 = vpop.xlane.xlu1 %121 }
 0x1ea   :  { %v126_v29 = vmul.f32 0.03125, %v122_v28 }
 0x1ec   :  { %v128_v30 = vadd.f32 1e-05, %v126_v29 }
 0x1ed   :  { %v125_v31 = vpop.xlane.xlu1 %124 }
 0x1ee   :  { %196 = vrsqrt.f32 %v128_v30  ;;  %v127_v32 = vmul.f32 0.03125, %v125_v31 }
 0x1f0   :  { %v129_v33 = vadd.f32 1e-05, %v127_v32 }
 0x1f2   :  { %198 = vrsqrt.f32 %v129_v33 }
 0x1fb   :  { %v197_v34 = vpop.eup %196 }
 0x1fc   :  { %v132_v36 = vmul.f32 %v197_v34, %v116_v20 }
 0x1fe   :  { %v140_v38 = vmul.f32 %v170_v35, %v132_v36 }
 0x1ff   :  { %v199_v39 = vpop.eup %198 }
 0x200   :  { %v148_v40 = vadd.f32 %v171_v37, %v140_v38  ;;  %v133_v41 = vmul.f32 %v199_v39, %v117_v24 }
 0x202   :  { %v174_v42 = vpack.c.bf16 %v148_v40, %v148_v40  ;;  %v141_v43 = vmul.f32 %v170_v35, %v133_v41 }
 0x204   :  { %159 = vst.msk [vmem:[%s275_s6] sm:$0xf] %vm158_vm2, %v174_v42  ;;  %v149_v44 = vadd.f32 %v171_v37, %v141_v43 }
 0x206   :  { %v175_v45 = vpack.c.bf16 %v149_v44, %v149_v44 }
 0x208   :  { %160 = vst.msk [vmem:[%s275_s6 + $0x4] sm:$0xf] %vm158_vm2, %v175_v45 }

// kernel: _lambda_.27
= control target key start
LH: loop header
LB: loop body
LE: loop exit
PB: predicated region body
PF: predicated region fallthrough
CT: control target
= control target key end

     0   :  { %vm31_vm0 = vcmask 261120   ;;  %v332_v0 = vmov 0.0   ;;  %vm333_vm1 = vmmov 0   ;;  %vm146_vm2 = vcmask 523264   ;;  %s422_s1 = inlined_call_operand.vmem [shape: bf16[32,64], index: 1, kind: input, shape index: {}]   ;;  %s423_s0 = inlined_call_operand.vmem [shape: bf16[16,32], index: 0, kind: input, shape index: {}]   ;;  %s424_s3 = inlined_call_operand.vmem [shape: bf16[64,32], index: 3, kind: input, shape index: {}]   ;;  %s425_s2 = inlined_call_operand.vmem [shape: f32[1,64], index: 2, kind: input, shape index: {}]   ;;  %s426_s4 = inlined_call_operand.vmem [shape: f32[1,32], index: 4, kind: input, shape index: {}]   ;;  %s427_s5 = inlined_call_operand.vmem [shape: f32[1,32], index: 5, kind: input, shape index: {}]   ;;  %s428_s6 = inlined_call_operand.vmem [shape: f32[1,32], index: 6, kind: input, shape index: {}]   ;;  %s429_s7 = inlined_call_operand.vmem [shape: bf16[16,32], index: 7, kind: output, shape index: {}]  }
   0x1   :  { %298 = vmatprep.subr.bf16.mxu0 %v332_v0  ;;  %v320_v1 = vld [vmem:[%s422_s1 + $0x8] sm:$0xff]   ;;  %302 = vmatprep.mubr.msk.bf16.mxu0 %vm333_vm1, %v332_v0  ;;  %32 = vst.msk [vmem:[#allocation2] sm:$0xff] %vm31_vm0, %v332_v0  ;;  %33 = vst.msk [vmem:[#allocation2 + $0x8] sm:$0xff] %vm31_vm0, %v332_v0  ;;  %v321_v2 = vld [vmem:[%s422_s1] sm:$0xff]   ;;  %vm266_vm3 = vcmask 257024  }
   0x2   :  { %306 = vmatprep.subr.bf16.mxu1 %v332_v0  ;;  %314 = vmatprep.mubr.msk.bf16.mxu1 %vm333_vm1, %v332_v0  ;;  %v34_v3 = vld [vmem:[%s423_s0] sm:$0xff]   ;;  %v323_v4 = vld [vmem:[%s424_s3 + $0x18] sm:$0xff]   ;;  %v324_v5 = vld [vmem:[%s424_s3 + $0x10] sm:$0xff]  }
   0x3   :  { %299 = vmatpush3.bf16.msra.mxu0 %v320_v1  ;;  %307 = vmatpush3.bf16.msra.mxu1 %v323_v4  ;;  %v325_v6 = vld [vmem:[%s424_s3 + $0x8] sm:$0xff]   ;;  %v326_v7 = vld [vmem:[%s424_s3] sm:$0xff]   ;;  %v209_v27 = vunpack.c.l.bf16 %v34_v3  ;;  %v210_v31 = vunpack.c.h.bf16 %v34_v3 }
   0x4   :  { %300 = vmatprep.subr.bf16.mxu0 %v332_v0  ;;  %308 = vmatprep.subr.bf16.mxu1 %v332_v0  ;;  %v273_v8 = vld [vmem:[%s425_s2] ss:$0 sm:$0xff] }
   0x5   :  { %v283_v26 = vld [vmem:[%s426_s4] ss:$0 sm:$0xff] }
   0x6   :  { %v284_v54 = vld [vmem:[%s427_s5] ss:$0 sm:$0xff] }
   0x7   :  { %301 = vmatpush3.bf16.msra.mxu0 %v321_v2  ;;  %309 = vmatpush3.bf16.msra.mxu1 %v324_v5  ;;  %v285_v56 = vld [vmem:[%s428_s6] ss:$0 sm:$0xff] }
   0x8   :  { %310 = vmatprep.subr.bf16.mxu1 %v332_v0  ;;  %v111_v18 = vld [vmem:[#allocation2] sm:$0xff]  ;;  %v112_v22 = vld [vmem:[#allocation2 + $0x8] sm:$0xff] }
   0xa   :  { %303 = vmatmul.mubr.msk.bf16.vlgmr.msra.gmra.mxu0 %vm31_vm0, %v34_v3 }
   0xb   :  { %311 = vmatpush3.bf16.msra.mxu1 %v325_v6 }
   0xc   :  { %312 = vmatprep.subr.bf16.mxu1 %v332_v0 }
   0xf   :  { %313 = vmatpush3.bf16.msra.mxu1 %v326_v7 }
  0xca   :  { %v102_v9 = vpop.f32.mrf.mxu0 }
  0xcb   :  { %v103_v11 = vadd.f32 %v273_v8, %v102_v9 }
  0xcc   :  { %v304_v10 = vpop.f32.mrf.mxu0 }
  0xcd   :  { %v109_v15 = vmax.f32 %v103_v11, 0.0 }
  0xce   :  { %v105_v12 = vpop.f32.mrf.mxu0 }
  0xcf   :  { %v106_v13 = vadd.f32 %v273_v8, %v105_v12 }
  0xd0   :  { %v305_v14 = vpop.f32.mrf.mxu0 }
  0xd1   :  { %v110_v16 = vmax.f32 %v106_v13, 0.0 }
  0xd3   :  { %v113_v17 = vpack.c.bf16 %v110_v16, %v109_v15 }
  0xd5   :  { %315 = vmatmul.mubr.msk.bf16.vlgmr.msra.gmra.mxu1 %vm146_vm2, %v113_v17 }
 0x195   :  { %v184_v19 = vpop.f32.mrf.mxu1 }
 0x196   :  { %v191_v20 = vadd.f32 %v184_v19, %v111_v18 }
 0x197   :  { %v316_v21 = vpop.f32.mrf.mxu1 }
 0x198   :  { %193 = vst.msk [vmem:[#allocation2] sm:$0xff] %vm31_vm0, %v191_v20 }
 0x199   :  { %v187_v23 = vpop.f32.mrf.mxu1 }
 0x19a   :  { %v192_v24 = vadd.f32 %v187_v23, %v112_v22 }
 0x19b   :  { %v317_v25 = vpop.f32.mrf.mxu1 }
 0x19c   :  { %194 = vst.msk [vmem:[#allocation2 + $0x8] sm:$0xff] %vm31_vm0, %v192_v24 }
 0x19f   :  { %v198_v28 = vld [vmem:[#allocation2] sm:$0xff] }
 0x1a0   :  { %v207_v29 = vadd.f32 %v283_v26, %v198_v28 }
 0x1a2   :  { %v211_v30 = vadd.f32 %v209_v27, %v207_v29 }
 0x1a3   :  { %v199_v32 = vld [vmem:[#allocation2 + $0x8] sm:$0xff] }
 0x1a4   :  { %v215_v33 = vsel %vm31_vm0, %v211_v30, 0.0  ;;  %v208_v34 = vadd.f32 %v283_v26, %v199_v32 }
 0x1a5   :  { %216 = vadd.xlane.f32.xlu0 %v215_v33 }
 0x1a6   :  { %v212_v35 = vadd.f32 %v210_v31, %v208_v34 }
 0x1a8   :  { %v218_v36 = vsel %vm31_vm0, %v212_v35, 0.0 }
 0x1a9   :  { %219 = vadd.xlane.f32.xlu0 %v218_v36 }
 0x22e   :  { %v217_v37 = vpop.xlane.xlu0 %216 }
 0x22f   :  { %v222_v38 = vmul.f32 0.03125, %v217_v37 }
 0x231   :  { %v224_v39 = vsub.f32 %v211_v30, %v222_v38 }
 0x232   :  { %v220_v40 = vpop.xlane.xlu0 %219 }
 0x233   :  { %v223_v41 = vmul.f32 0.03125, %v220_v40  ;;  %v226_v42 = vmul.f32 %v224_v39, %v224_v39 }
 0x235   :  { %v225_v43 = vsub.f32 %v212_v35, %v223_v41  ;;  %v228_v44 = vsel %vm31_vm0, %v226_v42, 0.0 }
 0x236   :  { %229 = vadd.xlane.f32.xlu1 %v228_v44 }
 0x237   :  { %v227_v45 = vmul.f32 %v225_v43, %v225_v43 }
 0x239   :  { %v231_v46 = vsel %vm31_vm0, %v227_v45, 0.0 }
 0x23a   :  { %232 = vadd.xlane.f32.xlu1 %v231_v46 }
 0x2bf   :  { %v230_v47 = vpop.xlane.xlu1 %229 }
 0x2c0   :  { %v234_v48 = vmul.f32 0.03125, %v230_v47 }
 0x2c2   :  { %v236_v49 = vadd.f32 1e-05, %v234_v48 }
 0x2c3   :  { %v233_v50 = vpop.xlane.xlu1 %232 }
 0x2c4   :  { %328 = vrsqrt.f32 %v236_v49  ;;  %v235_v51 = vmul.f32 0.03125, %v233_v50 }
 0x2c6   :  { %v237_v52 = vadd.f32 1e-05, %v235_v51 }
 0x2c8   :  { %330 = vrsqrt.f32 %v237_v52 }
 0x2d1   :  { %v329_v53 = vpop.eup %328 }
 0x2d2   :  { %v240_v55 = vmul.f32 %v329_v53, %v224_v39 }
 0x2d4   :  { %v248_v57 = vmul.f32 %v284_v54, %v240_v55 }
 0x2d5   :  { %v331_v58 = vpop.eup %330 }
 0x2d6   :  { %v256_v59 = vadd.f32 %v285_v56, %v248_v57  ;;  %v241_v60 = vmul.f32 %v331_v58, %v225_v43 }
 0x2d8   :  { %v288_v61 = vpack.c.bf16 %v256_v59, %v256_v59  ;;  %v249_v62 = vmul.f32 %v284_v54, %v241_v60 }
 0x2da   :  { %267 = vst.msk [vmem:[%s429_s7] sm:$0xf] %vm266_vm3, %v288_v61  ;;  %v257_v63 = vadd.f32 %v285_v56, %v249_v62 }
 0x2dc   :  { %v289_v0 = vpack.c.bf16 %v257_v63, %v257_v63 }
 0x2de   :  { %268 = vst.msk [vmem:[%s429_s7 + $0x4] sm:$0xf] %vm266_vm3, %v289_v0 }

// kernel: _lambda_.36
= control target key start
LH: loop header
LB: loop body
LE: loop exit
PB: predicated region body
PF: predicated region fallthrough
CT: control target
= control target key end

     0   :  { %v145_v0 = vmov 0.0   ;;  %vm146_vm0 = vmmov 0   ;;  %vm47_vm1 = vcmask 261120   ;;  %vm100_vm2 = vcmask 257024   ;;  %s201_s1 = inlined_call_operand.vmem [shape: bf16[32,64], index: 1, kind: input, shape index: {}]   ;;  %s202_s0 = inlined_call_operand.vmem [shape: bf16[16,32], index: 0, kind: input, shape index: {}]   ;;  %s203_s2 = inlined_call_operand.vmem [shape: f32[1,64], index: 2, kind: input, shape index: {}]   ;;  %s204_s3 = inlined_call_operand.vmem [shape: bf16[16,32], index: 3, kind: output, shape index: {0}]   ;;  %s205_s4 = inlined_call_operand.vmem [shape: bf16[16,32], index: 4, kind: output, shape index: {1}]  }
   0x1   :  { %131 = vmatprep.subr.bf16.mxu0 %v145_v0  ;;  %v142_v1 = vld [vmem:[%s201_s1 + $0x8] sm:$0xff]   ;;  %135 = vmatprep.mubr.msk.bf16.mxu0 %vm146_vm0, %v145_v0  ;;  %v143_v2 = vld [vmem:[%s201_s1] sm:$0xff]  }
   0x2   :  { %132 = vmatpush3.bf16.msra.mxu0 %v142_v1  ;;  %v144_v3 = vld [vmem:[%s202_s0] sm:$0xff]   ;;  %s147_s0 = smov 96  }
   0x3   :  { %133 = vmatprep.subr.bf16.mxu0 %v145_v0  ;;  %v119_v4 = vld [vmem:[%s203_s2] ss:$0 sm:$0xff] }
   0x6   :  { %134 = vmatpush3.bf16.msra.mxu0 %v143_v2 }
   0x9   :  { %136 = vmatmul.mubr.msk.bf16.vlgmr.msra.gmra.mxu0 %vm47_vm1, %v144_v3 }
  0xc9   :  { %v85_v5 = vpop.f32.mrf.mxu0 }
  0xca   :  { %v86_v6 = vadd.f32 %v119_v4, %v85_v5 }
  0xcb   :  { %v137_v7 = vpop.f32.mrf.mxu0 }
  0xcc   :  { %v126_v8 = vpack.c.bf16 %v86_v6, %v86_v6 }
  0xcd   :  { %v88_v9 = vpop.f32.mrf.mxu0 }
  0xce   :  { %101 = vst.msk [vmem:[%s204_s3] sm:$0xf] %vm100_vm2, %v126_v8  ;;  %v89_v10 = vadd.f32 %v119_v4, %v88_v9  ;;  %103 = vrot.lane.b32.xlu0 %v126_v8, %s147_s0 }
  0xcf   :  { %v138_v11 = vpop.f32.mrf.mxu0 }
  0xd0   :  { %v127_v12 = vpack.c.bf16 %v89_v10, %v89_v10 }
  0xd2   :  { %102 = vst.msk [vmem:[%s204_s3 + $0x4] sm:$0xf] %vm100_vm2, %v127_v12  ;;  %105 = vrot.lane.b32.xlu0 %v127_v12, %s147_s0 }
 0x140   :  { %v104_v13 = vpop.permute.xlu0 %103 }
 0x141   :  { %109 = vst.msk [vmem:[%s205_s4] sm:$0xf] %vm100_vm2, %v104_v13 }
 0x144   :  { %v106_v14 = vpop.permute.xlu0 %105 }
 0x145   :  { %110 = vst.msk [vmem:[%s205_s4 + $0x4] sm:$0xf] %vm100_vm2, %v106_v14 }

// kernel: _lambda_.33
= control target key start
LH: loop header
LB: loop body
LE: loop exit
PB: predicated region body
PF: predicated region fallthrough
CT: control target
= control target key end

     0   :  { %s1032_s0 = inlined_call_operand.vmem [shape: f32[2,8], index: 0, kind: input, shape index: {}]   ;;  %s1033_s1 = inlined_call_operand.vmem [shape: bf16[2,4,8,8], index: 1, kind: input, shape index: {}]   ;;  %s1034_s2 = inlined_call_operand.vmem [shape: bf16[2,4,8,8], index: 2, kind: input, shape index: {}]   ;;  %s1035_s3 = inlined_call_operand.vmem [shape: bf16[2,4,8,8], index: 3, kind: input, shape index: {}]   ;;  %s1036_s4 = inlined_call_operand.vmem [shape: bf16[2,4,8,8], index: 4, kind: output, shape index: {0}]   ;;  %s1037_s5 = inlined_call_operand.hbm [shape: f32[2,4,8,8], index: 5, kind: output, shape index: {1}]  }
   0x1   :  { %1038 = sst [smem:[#allocation5_spill]] %s1032_s0 }
   0x2   :  { %1039 = sst [smem:[#allocation6_spill]] %s1033_s1 }
   0x3   :  { %1040 = sst [smem:[#allocation7_spill]] %s1034_s2 }
   0x4   :  { %11 = vsyncpa [#allocation3], 0 }
   0x5   :  { %13 = vsyncpa [#allocation3 + $0x1], 0  ;;  %s883_s18 = smov 0   ;;  %s885_s19 = smov 0  }
   0x6   :  { %s887_s20 = smov 0   ;;  %s889_s21 = smov 0  }
   0x7   :  { %s891_s22 = smov 0   ;;  %s893_s23 = smov 0  }
   0x8   :  { %s895_s24 = smov 0   ;;  %s897_s25 = smov 0  }
   0x9 LB: > { %s640_s26 = sadd.s32 4294967295, %s847_s25   ;;  %s641_s27 = sadd.s32 4294967294, %s847_s25   ;;  %s847_s25 = sphi %s897_s25, %s19_s25   ;;  %s843_s24 = sphi %s895_s24, %s1052_s24   ;;  %s839_s23 = sphi %s893_s23, %s1051_s23   ;;  %s835_s22 = sphi %s891_s22, %s1050_s22   ;;  %s831_s21 = sphi %s889_s21, %s1049_s21   ;;  %s827_s20 = sphi %s887_s20, %s1048_s20   ;;  %s823_s19 = sphi %s885_s19, %s1047_s19   ;;  %s819_s18 = sphi %s883_s18, %s1046_s18  }
   0xa   : > { %s28_s28 = sadd.s32 1, %s839_s23  ;;  %s31_s29 = sadd.s32 1, %s843_s24 }
   0xb   : > { %p29_p0 = scmp.ge.s32.totalorder %s28_s28, 4  ;;  %p183_p1 = scmp.ne.s32.totalorder %s827_s20, %s823_s19 }
   0xc   : > { %p184_p2 = scmp.eq.s32.totalorder %s640_s26, 7  ;;  %p189_p5 = scmp.ne.s32.totalorder %s823_s19, %s819_s18 }
   0xd   : > { %s1054_s28 = smov (%p29_p0, %s28_s28), 0  ;;  %s1056_s29 = smov (!%p29_p0, %s31_s29), %s843_s24 }
   0xe   : > { %s169_s30 = ssub.s32 %s839_s23, %s1054_s28  ;;  %p934_p3 = por %p184_p2, %p183_p1 }
   0xf   : > { %p33_p4 = scmp.ge.s32.totalorder %s1056_s29, 2  ;;  %p190_p6 = scmp.eq.s32.totalorder %s641_s27, 7 }
  0x10   : > { %p644_p7 = scmp.ge.s32.totalorder %s847_s25, 1  ;;  %p244_p9 = scmp.lt.s32.totalorder %s847_s25, 9 }
  0x11   : > { %s1058_s29 = smov (%p33_p4, %s1056_s29), 0  ;;  %p943_p8 = por %p190_p6, %p189_p5 }
  0x12   : > { %s168_s8 = ssub.s32 %s843_s24, %s1058_s29  ;;  %s173_s9 = sadd.s32 1, %s827_s20 }
  0x13   : > { %s170_s10 = sor.u32 %s169_s30, %s168_s8  ;;  %p245_p10 = pnand %p644_p7, %p244_p9 }
  0x14   : > { %p171_p11 = scmp.eq.s32.totalorder %s170_s10, 0  ;;  %p299_p12 = scmp.lt.s32.totalorder (!%p245_p10), %s835_s22, 1 }
  0x15   : > { %248 = sbr.rel (%p245_p10) target bundleno = 750 (0x2ee), region = 36  ;;  %p301_p13 = scmp.lt.s32.totalorder (!%p245_p10), %s831_s21, 3 }
  0x16   : > { %s952_s11 = scalar_select %p171_p11, %s827_s20, %s173_s9  }
  0x17   : > { %s1043_s2 = sld [smem:[#allocation7_spill]] (!%p245_p10)  ;;  %s296_s26 = sand.u32 (!%p245_p10), 1, %s823_s19  }
  0x18   : > { %s1044_s1 = sld [smem:[#allocation6_spill]] (!%p245_p10)  ;;  %s657_s8 = sshll.u32 (!%p245_p10), %s835_s22, 2 }
  0x19   : > { %s1045_s0 = sld [smem:[#allocation5_spill]] (!%p245_p10) }
  0x1a   : > { %v849_v0 = vmov 0.0   ;;  %vm850_vm0 = vmmov 0   ;;  %s300_s12 = scalar_select %p299_p12, %s835_s22, 1  ;;  %vm335_vm1 = vcmask 64512   ;;  %v386_v4 = vlaneseq }
  0x1b   : > { %665 = vmatprep.subr.bf16.mxu0 %v849_v0  ;;  %667 = vmatprep.mubr.msk.bf16.mxu0 %vm850_vm0, %v849_v0  ;;  %s302_s13 = scalar_select %p301_p13, %s831_s21, 3  ;;  %v851_v8 = vmov 0   ;;  %vm414_vm6 = vcmask 1043456  }
  0x1c   : > { %671 = vmatprep.subr.bf16.mxu1 %v849_v0  ;;  %673 = vmatprep.mubr.msk.bf16.mxu1 %vm850_vm0, %v849_v0  ;;  %s646_s14 = sshll.u32 %s300_s12, 2  ;;  %v387_v6 = vshrl.u32 %v386_v4, 7  ;;  %v389_v10 = vand.u32 127, %v386_v4 }
  0x1d   : > { %s304_s15 = sadd.s32 %s646_s14, %s302_s13 }
  0x1e   : > { %s958_s16 = sshll.u32 %s304_s15, 2  ;;  %v394_v7 = vsub.s32 0, %v387_v6  ;;  %vm390_vm3 = vcmp.ge.s32.totalorder %v387_v6, %v389_v10 }
  0x1f   : > { %s314_s27 = scalar_lea.vmem %s1043_s2, %s958_s16  ;;  %s306_s9 = scalar_lea.vmem %s1044_s1, %s958_s16 }
  0x20   : > { %v333_v1 = vld [vmem:[%s314_s27] sm:$0xf]  ;;  %s383_s13 = scalar_lea.vmem %s1045_s0, %s835_s22  ;;  %s322_s17 = scalar_lea.vmem %s1035_s3, %s958_s16 }
  0x21   : > { %v340_v2 = vsel %vm335_vm1, %v333_v1, 0  ;;  %v332_v3 = vld [vmem:[%s306_s9] sm:$0xf]  ;;  %s645_s27 = sshll.u32 %s296_s26, 3  ;;  %s485_s9 = sadd.s32 %s831_s21, %s657_s8 }
  0x22   : > { %666 = vmatpush3.bf16.xpose.msra.mxu0 %v340_v2  ;;  %v384_v5 = vld [vmem:[%s383_s13] sm:$0x1]  ;;  %s298_s30 = scalar_lea.vmem [#allocation2], %s645_s27  ;;  %s658_s10 = sshll.u32 %s485_s9, 7 }
  0x23   : > { %vm385_vm2 = vcmp.gt.f32.partialorder %v384_v5, 0.5  ;;  %v334_v24 = vld [vmem:[%s322_s17] sm:$0xf]  ;;  %s489_s12 = sshll.u32 %s298_s30, 4  ;;  %s487_s15 = scalar_lea.hbm %s1037_s5, %s658_s10  ;;  %s490_s12 = int_to_ptr.vmem [resolvable:$true] %s489_s12 }
  0x24   : > { %v391_v9 = vsel %vm385_vm2, 1, %v851_v8  ;;  %v416_v25 = vsel %vm414_vm6, %v334_v24, 0  ;;  %s471_s17 = scalar_lea.sflag [#allocation3], %s296_s26  ;;  %s755_s0 = scalar_lea.vmem %s490_s12, 128 }
  0x25   : > { %v395_v11 = vrot.slane %v391_v9, %v394_v7  ;;  %672 = vmatpush3.bf16.msra.mxu1 %v416_v25  ;;  %p756_p0 = scmp.ne.s32.totalorder %s490_s12, %s755_s0  ;;  %s852_s27 = smov [#allocation2]  }
  0x26   : > { %s759_s1 = sshll.u32 %s852_s27, 4  ;;  %s760_s1 = int_to_ptr.vmem [resolvable:$false] %s759_s1 }
  0x27   : > { %vm396_vm4 = vcmp.eq.s32.totalorder %v395_v11, 1  ;;  %p757_p1 = pnand %p756_p0, %p934_p3  ;;  %s761_s2 = scalar_lea.vmem %s760_s1, 256 }
  0x28   : > { %vm397_vm5 = vmand %vm396_vm4, %vm390_vm3  ;;  %p762_p4 = scmp.lt.s32.totalorder %s490_s12, %s760_s1  ;;  %p763_p5 = scmp.lt.s32.totalorder %s761_s2, %s755_s0 }
  0x29   : > { %668 = vmatmul.mubr.msk.bf16.vlgmr.msra.gmra.mxu0 %vm335_vm1, %v332_v3  ;;  %p758_p2 = pneg %p757_p1 }
  0x2a   : > { %p764_p6 = por %p763_p5, %p762_p4 }
  0x2c   : > { %p765_p7 = pnand %p764_p6, %p758_p2 }
  0xe9   : > { %v376_v12 = vpop.f32.mrf.mxu0 }
  0xea   : > { %v382_v13 = vmul.f32 0.35355338, %v376_v12 }
  0xeb   : > { %v669_v14 = vpop.f32.mrf.mxu0 }
  0xec   : > { %v398_v15 = vsel %vm397_vm5, %v382_v13, -1e+09 }
  0xed   : > { %v379_v16 = vpop.f32.mrf.mxu0  ;;  %v399_v17 = vsel %vm335_vm1, %v398_v15, -inf }
  0xee   : > { %400 = vmax.xlane.f32.xlu0 %v399_v17 }
  0xef   : > { %v670_v18 = vpop.f32.mrf.mxu0 }
 0x177   : > { %v401_v19 = vpop.xlane.xlu0 %400 }
 0x178   : > { %v402_v20 = vsub.f32 %v398_v15, %v401_v19 }
 0x17a   : > { %v403_v21 = vmul.f32 1.442695, %v402_v20 }
 0x17c   : > { %751 = vpow2.f32 %v403_v21 }
 0x189   : > { %v752_v22 = vpop.eup %751 }
 0x18a   : > { %v405_v23 = vsel %vm335_vm1, %v752_v22, 0.0 }
 0x18b   : > { %406 = vadd.xlane.f32.xlu0 %v405_v23 }
 0x214   : > { %v407_v26 = vpop.xlane.xlu0 %406 }
 0x215   : > { %753 = vrcp.f32 %v407_v26 }
 0x222   : > { %v754_v27 = vpop.eup %753 }
 0x223   : > { %v409_v28 = vmul.f32 %v754_v27, %v752_v22 }
 0x225   : > { %v410_v29 = vpack.c.bf16 %v409_v28, %v409_v28  ;;  %461 = vst.msk [vmem:[%s298_s30] sm:$0xff] %vm335_vm1, %v409_v28 }
 0x227   : > { %674 = vmatmul.mubr.msk.bf16.vlgmr.msra.gmra.mxu1 %vm335_vm1, %v410_v29 }
 0x228   : > { %768 = shalt.err (!%p765_p7)
}
 0x229   : > { %s769_s21 = scalar_lea.hbm %s487_s15, 128  ;;  %s773_s30 = scalar_lea.hbm %s1037_s5, 1024 }
 0x22a   : > { %p770_p9 = scmp.ne.s32.totalorder %s487_s15, %s769_s21  ;;  %p774_p12 = scmp.lt.s32.totalorder %s487_s15, %s1037_s5 }
 0x22b   : > { %p775_p13 = scmp.lt.s32.totalorder %s773_s30, %s769_s21 }
 0x22c   : > { %p771_p10 = pnand %p770_p9, %p934_p3 }
 0x22d   : > { %p776_p0 = por %p775_p13, %p774_p12 }
 0x22e   : > { %p772_p11 = pneg %p771_p10 }
 0x230   : > { %p777_p1 = pnand %p776_p0, %p772_p11 }
 0x232   : > { %780 = shalt.err (!%p777_p1)
}
 0x233   : > { %677 = dma.vmem_to_hbm [thread:$0]  (%p934_p3), %s490_s12, 128, %s487_s15, %s471_s17   ;;  %vm459_vm7 = vcmask 60416  }
 0x234   : > { %s330_s2 = scalar_lea.vmem %s1036_s4, %s958_s16 }
 0x2e7   : > { %v452_v30 = vpop.f32.mrf.mxu1 }
 0x2e8   : > { %v458_v31 = vpack.c.bf16 %v452_v30, %v452_v30 }
 0x2e9   : > { %v675_v32 = vpop.f32.mrf.mxu1 }
 0x2ea   : > { %460 = vst.msk [vmem:[%s330_s2] sm:$0xf] %vm459_vm7, %v458_v31 }
 0x2eb   : > { %v455_v33 = vpop.f32.mrf.mxu1 }
 0x2ed   : > { %v676_v34 = vpop.f32.mrf.mxu1 }
 0x2ee PF: > { %p683_p2 = scmp.ge.s32.totalorder %s847_s25, 2  ;;  %s512_s10 = sand.u32 1, %s819_s18  }
 0x2ef   : > { %s513_s6 = scalar_lea.sflag [#allocation3], %s512_s10 }
 0x2f0   : > { %p680_p4 = pnand %p683_p2, %p943_p8 }
 0x2f2   : > { %p681_p3 = pneg %p680_p4 }
 0x2f4   : > { %814 = dma.done.wait (%p681_p3), %s513_s6, 128  }
 0x2f5   : > { %816 = vsyncadd (%p681_p3), %s513_s6, 4294967168  ;;  %s19_s25 = sadd.s32 1, %s847_s25   ;;  %s1046_s18 = smov %s823_s19 }
 0x2f6   : > { %p16_p5 = scmp.ge.s32.totalorder %s19_s25, 10   ;;  %s1047_s19 = smov %s827_s20 }
 0x2f7   : > { %s1048_s20 = smov %s952_s11  ;;  %s1049_s21 = smov %s839_s23 }
 0x2f8   : > { %s1050_s22 = smov %s843_s24  ;;  %s1051_s23 = smov %s1054_s28 }
 0x2f9   : > { %s1052_s24 = smov %s1058_s29  ;;  %18 = sbr.rel (!%p16_p5) target bundleno = 9 (0x9), region = 90 }
 0x2fe   :  { %518 = vsyncpa [#allocation3], 1 }
 0x2ff   :  { %520 = vsyncpa [#allocation3 + $0x1], 1 }

// kernel: _lambda_.35
= control target key start
LH: loop header
LB: loop body
LE: loop exit
PB: predicated region body
PF: predicated region fallthrough
CT: control target
= control target key end

     0   :  { %v130_v0 = vmov 0.0   ;;  %vm131_vm0 = vmmov 0   ;;  %vm45_vm1 = vcmask 261120   ;;  %vm98_vm2 = vcmask 257024   ;;  %s170_s1 = inlined_call_operand.vmem [shape: bf16[32,32], index: 1, kind: input, shape index: {}]   ;;  %s171_s0 = inlined_call_operand.vmem [shape: bf16[16,32], index: 0, kind: input, shape index: {}]   ;;  %s172_s2 = inlined_call_operand.vmem [shape: f32[1,32], index: 2, kind: input, shape index: {}]   ;;  %s173_s3 = inlined_call_operand.vmem [shape: bf16[16,32], index: 3, kind: output, shape index: {}]  }
   0x1   :  { %117 = vmatprep.subr.bf16.mxu0 %v130_v0  ;;  %v127_v1 = vld [vmem:[%s170_s1 + $0x8] sm:$0xff]   ;;  %121 = vmatprep.mubr.msk.bf16.mxu0 %vm131_vm0, %v130_v0  ;;  %v128_v2 = vld [vmem:[%s170_s1] sm:$0xff]  }
   0x2   :  { %118 = vmatpush3.bf16.msra.mxu0 %v127_v1  ;;  %v129_v3 = vld [vmem:[%s171_s0] sm:$0xff]  }
   0x3   :  { %119 = vmatprep.subr.bf16.mxu0 %v130_v0  ;;  %v105_v4 = vld [vmem:[%s172_s2] ss:$0 sm:$0xff] }
   0x6   :  { %120 = vmatpush3.bf16.msra.mxu0 %v128_v2 }
   0x9   :  { %122 = vmatmul.mubr.msk.bf16.vlgmr.msra.gmra.mxu0 %vm45_vm1, %v129_v3 }
  0xc9   :  { %v83_v5 = vpop.f32.mrf.mxu0 }
  0xca   :  { %v84_v6 = vadd.f32 %v105_v4, %v83_v5 }
  0xcb   :  { %v123_v7 = vpop.f32.mrf.mxu0 }
  0xcc   :  { %v112_v8 = vpack.c.bf16 %v84_v6, %v84_v6 }
  0xcd   :  { %v86_v9 = vpop.f32.mrf.mxu0 }
  0xce   :  { %99 = vst.msk [vmem:[%s173_s3] sm:$0xf] %vm98_vm2, %v112_v8  ;;  %v87_v10 = vadd.f32 %v105_v4, %v86_v9 }
  0xcf   :  { %v124_v11 = vpop.f32.mrf.mxu0 }
  0xd0   :  { %v113_v12 = vpack.c.bf16 %v87_v10, %v87_v10 }
  0xd2   :  { %100 = vst.msk [vmem:[%s173_s3 + $0x4] sm:$0xf] %vm98_vm2, %v113_v12 }

// kernel: _lambda_.37
= control target key start
LH: loop header
LB: loop body
LE: loop exit
PB: predicated region body
PF: predicated region fallthrough
CT: control target
= control target key end

     0   :  { %s1026_s0 = inlined_call_operand.vmem [shape: f32[2,8], index: 0, kind: input, shape index: {}]   ;;  %s1027_s1 = inlined_call_operand.vmem [shape: bf16[2,4,8,8], index: 1, kind: input, shape index: {}]   ;;  %s1028_s2 = inlined_call_operand.vmem [shape: bf16[2,4,8,8], index: 2, kind: input, shape index: {}]   ;;  %s1029_s3 = inlined_call_operand.vmem [shape: bf16[2,4,8,8], index: 3, kind: input, shape index: {}]   ;;  %s1030_s4 = inlined_call_operand.vmem [shape: bf16[2,4,8,8], index: 4, kind: output, shape index: {0}]   ;;  %s1031_s5 = inlined_call_operand.hbm [shape: f32[2,4,8,8], index: 5, kind: output, shape index: {1}]  }
   0x1   :  { %1032 = sst [smem:[#allocation5_spill]] %s1026_s0 }
   0x2   :  { %1033 = sst [smem:[#allocation6_spill]] %s1027_s1 }
   0x3   :  { %1034 = sst [smem:[#allocation7_spill]] %s1028_s2 }
   0x4   :  { %11 = vsyncpa [#allocation3], 0 }
   0x5   :  { %13 = vsyncpa [#allocation3 + $0x1], 0  ;;  %s877_s18 = smov 0   ;;  %s879_s19 = smov 0  }
   0x6   :  { %s881_s20 = smov 0   ;;  %s883_s21 = smov 0  }
   0x7   :  { %s885_s22 = smov 0   ;;  %s887_s23 = smov 0  }
   0x8   :  { %s889_s24 = smov 0   ;;  %s891_s25 = smov 0  }
   0x9 LB: > { %s634_s26 = sadd.s32 4294967295, %s841_s25   ;;  %s635_s27 = sadd.s32 4294967294, %s841_s25   ;;  %s841_s25 = sphi %s891_s25, %s19_s25   ;;  %s837_s24 = sphi %s889_s24, %s1046_s24   ;;  %s833_s23 = sphi %s887_s23, %s1045_s23   ;;  %s829_s22 = sphi %s885_s22, %s1044_s22   ;;  %s825_s21 = sphi %s883_s21, %s1043_s21   ;;  %s821_s20 = sphi %s881_s20, %s1042_s20   ;;  %s817_s19 = sphi %s879_s19, %s1041_s19   ;;  %s813_s18 = sphi %s877_s18, %s1040_s18  }
   0xa   : > { %s28_s28 = sadd.s32 1, %s833_s23  ;;  %s31_s29 = sadd.s32 1, %s837_s24 }
   0xb   : > { %p29_p0 = scmp.ge.s32.totalorder %s28_s28, 4  ;;  %p183_p1 = scmp.ne.s32.totalorder %s821_s20, %s817_s19 }
   0xc   : > { %p184_p2 = scmp.eq.s32.totalorder %s634_s26, 7  ;;  %p189_p5 = scmp.ne.s32.totalorder %s817_s19, %s813_s18 }
   0xd   : > { %s1048_s28 = smov (%p29_p0, %s28_s28), 0  ;;  %s1050_s29 = smov (!%p29_p0, %s31_s29), %s837_s24 }
   0xe   : > { %s169_s30 = ssub.s32 %s833_s23, %s1048_s28  ;;  %p928_p3 = por %p184_p2, %p183_p1 }
   0xf   : > { %p33_p4 = scmp.ge.s32.totalorder %s1050_s29, 2  ;;  %p190_p6 = scmp.eq.s32.totalorder %s635_s27, 7 }
  0x10   : > { %p638_p7 = scmp.ge.s32.totalorder %s841_s25, 1  ;;  %p244_p9 = scmp.lt.s32.totalorder %s841_s25, 9 }
  0x11   : > { %s1052_s29 = smov (%p33_p4, %s1050_s29), 0  ;;  %p937_p8 = por %p190_p6, %p189_p5 }
  0x12   : > { %s168_s8 = ssub.s32 %s837_s24, %s1052_s29  ;;  %s173_s9 = sadd.s32 1, %s821_s20 }
  0x13   : > { %s170_s10 = sor.u32 %s169_s30, %s168_s8  ;;  %p245_p10 = pnand %p638_p7, %p244_p9 }
  0x14   : > { %p171_p11 = scmp.eq.s32.totalorder %s170_s10, 0  ;;  %p299_p12 = scmp.lt.s32.totalorder (!%p245_p10), %s829_s22, 1 }
  0x15   : > { %248 = sbr.rel (%p245_p10) target bundleno = 750 (0x2ee), region = 36  ;;  %p301_p13 = scmp.lt.s32.totalorder (!%p245_p10), %s825_s21, 3 }
  0x16   : > { %s946_s11 = scalar_select %p171_p11, %s821_s20, %s173_s9  }
  0x17   : > { %s1037_s2 = sld [smem:[#allocation7_spill]] (!%p245_p10)  ;;  %s296_s26 = sand.u32 (!%p245_p10), 1, %s817_s19  }
  0x18   : > { %s1038_s1 = sld [smem:[#allocation6_spill]] (!%p245_p10)  ;;  %s651_s8 = sshll.u32 (!%p245_p10), %s829_s22, 2 }
  0x19   : > { %s1039_s0 = sld [smem:[#allocation5_spill]] (!%p245_p10) }
  0x1a   : > { %v843_v0 = vmov 0.0   ;;  %vm844_vm0 = vmmov 0   ;;  %s300_s12 = scalar_select %p299_p12, %s829_s22, 1  ;;  %vm335_vm1 = vcmask 64512   ;;  %v387_v4 = vlaneseq }
  0x1b   : > { %659 = vmatprep.subr.bf16.mxu0 %v843_v0  ;;  %661 = vmatprep.mubr.msk.bf16.mxu0 %vm844_vm0, %v843_v0  ;;  %s302_s13 = scalar_select %p301_p13, %s825_s21, 3  ;;  %v845_v8 = vmov 0   ;;  %vm408_vm4 = vcmask 1043456  }
  0x1c   : > { %665 = vmatprep.subr.bf16.mxu1 %v843_v0  ;;  %667 = vmatprep.mubr.msk.bf16.mxu1 %vm844_vm0, %v843_v0  ;;  %s640_s14 = sshll.u32 %s300_s12, 2  ;;  %v388_v6 = vshrl.u32 %v387_v4, 7 }
  0x1d   : > { %s304_s15 = sadd.s32 %s640_s14, %s302_s13 }
  0x1e   : > { %s952_s16 = sshll.u32 %s304_s15, 2  ;;  %v389_v7 = vsub.s32 0, %v388_v6 }
  0x1f   : > { %s314_s27 = scalar_lea.vmem %s1037_s2, %s952_s16  ;;  %s306_s9 = scalar_lea.vmem %s1038_s1, %s952_s16 }
  0x20   : > { %v333_v1 = vld [vmem:[%s314_s27] sm:$0xf]  ;;  %s383_s13 = scalar_lea.vmem %s1039_s0, %s829_s22  ;;  %s322_s17 = scalar_lea.vmem %s1029_s3, %s952_s16 }
  0x21   : > { %v340_v2 = vsel %vm335_vm1, %v333_v1, 0  ;;  %v332_v3 = vld [vmem:[%s306_s9] sm:$0xf]  ;;  %s639_s27 = sshll.u32 %s296_s26, 3  ;;  %s479_s9 = sadd.s32 %s825_s21, %s651_s8 }
  0x22   : > { %660 = vmatpush3.bf16.xpose.msra.mxu0 %v340_v2  ;;  %v384_v5 = vld [vmem:[%s383_s13] sm:$0x1]  ;;  %s298_s30 = scalar_lea.vmem [#allocation2], %s639_s27  ;;  %s652_s10 = sshll.u32 %s479_s9, 7 }
  0x23   : > { %vm385_vm2 = vcmp.gt.f32.partialorder %v384_v5, 0.5  ;;  %v334_v23 = vld [vmem:[%s322_s17] sm:$0xf]  ;;  %s483_s12 = sshll.u32 %s298_s30, 4  ;;  %s481_s15 = scalar_lea.hbm %s1031_s5, %s652_s10  ;;  %s484_s12 = int_to_ptr.vmem [resolvable:$true] %s483_s12 }
  0x24   : > { %v386_v9 = vsel %vm385_vm2, 1, %v845_v8  ;;  %v410_v24 = vsel %vm408_vm4, %v334_v23, 0  ;;  %s465_s17 = scalar_lea.sflag [#allocation3], %s296_s26  ;;  %s749_s0 = scalar_lea.vmem %s484_s12, 128 }
  0x25   : > { %v390_v10 = vrot.slane %v386_v9, %v389_v7  ;;  %666 = vmatpush3.bf16.msra.mxu1 %v410_v24  ;;  %p750_p0 = scmp.ne.s32.totalorder %s484_s12, %s749_s0  ;;  %s846_s27 = smov [#allocation2]  }
  0x26   : > { %s753_s1 = sshll.u32 %s846_s27, 4  ;;  %s754_s1 = int_to_ptr.vmem [resolvable:$false] %s753_s1 }
  0x27   : > { %vm391_vm3 = vcmp.eq.s32.totalorder %v390_v10, 1  ;;  %p751_p1 = pnand %p750_p0, %p928_p3  ;;  %s755_s2 = scalar_lea.vmem %s754_s1, 256 }
  0x28   : > { %p756_p4 = scmp.lt.s32.totalorder %s484_s12, %s754_s1  ;;  %p757_p5 = scmp.lt.s32.totalorder %s755_s2, %s749_s0 }
  0x29   : > { %662 = vmatmul.mubr.msk.bf16.vlgmr.msra.gmra.mxu0 %vm335_vm1, %v332_v3  ;;  %p752_p2 = pneg %p751_p1 }
  0x2a   : > { %p758_p6 = por %p757_p5, %p756_p4 }
  0x2c   : > { %p759_p7 = pnand %p758_p6, %p752_p2 }
  0xe9   : > { %v376_v11 = vpop.f32.mrf.mxu0 }
  0xea   : > { %v382_v12 = vmul.f32 0.35355338, %v376_v11 }
  0xeb   : > { %v663_v13 = vpop.f32.mrf.mxu0 }
  0xec   : > { %v392_v14 = vsel %vm391_vm3, %v382_v12, -1e+09 }
  0xed   : > { %v379_v15 = vpop.f32.mrf.mxu0  ;;  %v393_v16 = vsel %vm335_vm1, %v392_v14, -inf }
  0xee   : > { %394 = vmax.xlane.f32.xlu0 %v393_v16 }
  0xef   : > { %v664_v17 = vpop.f32.mrf.mxu0 }
 0x177   : > { %v395_v18 = vpop.xlane.xlu0 %394 }
 0x178   : > { %v396_v19 = vsub.f32 %v392_v14, %v395_v18 }
 0x17a   : > { %v397_v20 = vmul.f32 1.442695, %v396_v19 }
 0x17c   : > { %745 = vpow2.f32 %v397_v20 }
 0x189   : > { %v746_v21 = vpop.eup %745 }
 0x18a   : > { %v399_v22 = vsel %vm335_vm1, %v746_v21, 0.0 }
 0x18b   : > { %400 = vadd.xlane.f32.xlu0 %v399_v22 }
 0x214   : > { %v401_v25 = vpop.xlane.xlu0 %400 }
 0x215   : > { %747 = vrcp.f32 %v401_v25 }
 0x222   : > { %v748_v26 = vpop.eup %747 }
 0x223   : > { %v403_v27 = vmul.f32 %v748_v26, %v746_v21 }
 0x225   : > { %v404_v28 = vpack.c.bf16 %v403_v27, %v403_v27  ;;  %455 = vst.msk [vmem:[%s298_s30] sm:$0xff] %vm335_vm1, %v403_v27 }
 0x227   : > { %668 = vmatmul.mubr.msk.bf16.vlgmr.msra.gmra.mxu1 %vm335_vm1, %v404_v28 }
 0x228   : > { %762 = shalt.err (!%p759_p7)
}
 0x229   : > { %s763_s21 = scalar_lea.hbm %s481_s15, 128  ;;  %s767_s30 = scalar_lea.hbm %s1031_s5, 1024 }
 0x22a   : > { %p764_p9 = scmp.ne.s32.totalorder %s481_s15, %s763_s21  ;;  %p768_p12 = scmp.lt.s32.totalorder %s481_s15, %s1031_s5 }
 0x22b   : > { %p769_p13 = scmp.lt.s32.totalorder %s767_s30, %s763_s21 }
 0x22c   : > { %p765_p10 = pnand %p764_p9, %p928_p3 }
 0x22d   : > { %p770_p0 = por %p769_p13, %p768_p12 }
 0x22e   : > { %p766_p11 = pneg %p765_p10 }
 0x230   : > { %p771_p1 = pnand %p770_p0, %p766_p11 }
 0x232   : > { %774 = shalt.err (!%p771_p1)
}
 0x233   : > { %671 = dma.vmem_to_hbm [thread:$0]  (%p928_p3), %s484_s12, 128, %s481_s15, %s465_s17   ;;  %vm453_vm5 = vcmask 60416  }
 0x234   : > { %s330_s2 = scalar_lea.vmem %s1030_s4, %s952_s16 }
 0x2e7   : > { %v446_v29 = vpop.f32.mrf.mxu1 }
 0x2e8   : > { %v452_v30 = vpack.c.bf16 %v446_v29, %v446_v29 }
 0x2e9   : > { %v669_v31 = vpop.f32.mrf.mxu1 }
 0x2ea   : > { %454 = vst.msk [vmem:[%s330_s2] sm:$0xf] %vm453_vm5, %v452_v30 }
 0x2eb   : > { %v449_v32 = vpop.f32.mrf.mxu1 }
 0x2ed   : > { %v670_v33 = vpop.f32.mrf.mxu1 }
 0x2ee PF: > { %p677_p2 = scmp.ge.s32.totalorder %s841_s25, 2  ;;  %s506_s10 = sand.u32 1, %s813_s18  }
 0x2ef   : > { %s507_s6 = scalar_lea.sflag [#allocation3], %s506_s10 }
 0x2f0   : > { %p674_p4 = pnand %p677_p2, %p937_p8 }
 0x2f2   : > { %p675_p3 = pneg %p674_p4 }
 0x2f4   : > { %808 = dma.done.wait (%p675_p3), %s507_s6, 128  }
 0x2f5   : > { %810 = vsyncadd (%p675_p3), %s507_s6, 4294967168  ;;  %s19_s25 = sadd.s32 1, %s841_s25   ;;  %s1040_s18 = smov %s817_s19 }
 0x2f6   : > { %p16_p5 = scmp.ge.s32.totalorder %s19_s25, 10   ;;  %s1041_s19 = smov %s821_s20 }
 0x2f7   : > { %s1042_s20 = smov %s946_s11  ;;  %s1043_s21 = smov %s833_s23 }
 0x2f8   : > { %s1044_s22 = smov %s837_s24  ;;  %s1045_s23 = smov %s1048_s28 }
 0x2f9   : > { %s1046_s24 = smov %s1052_s29  ;;  %18 = sbr.rel (!%p16_p5) target bundleno = 9 (0x9), region = 90 }
 0x2fe   :  { %512 = vsyncpa [#allocation3], 1 }
 0x2ff   :  { %514 = vsyncpa [#allocation3 + $0x1], 1 }

</bundles_post_ra>
